<compile_context>
chip_gen: v5e
topology: v5e:2x2
jax: 0.10.0
libtpu: 0.0.40
codegen_flags: <defaults>
</compile_context>

<pallas_src>
import math

import jax
import jax.numpy as jnp
from jax.experimental import pallas as pl
from jax.experimental.pallas import tpu as pltpu  # noqa: F401  (TPU backend)

BN_EPS = 1e-5
LEAKY_SLOPE = 0.2


# ----------------------------------------------------------------------------
# Fused kernel: all layers in one body, intermediates stay in vregs.
#   refs = (x, w0, w1, ..., w_{n-1}, b_final, out)
# ----------------------------------------------------------------------------
def _make_fused_kernel(n_layers):
    def kernel(x_ref, *refs):
        o_ref = refs[-1]
        b_final_ref = refs[-2]
        w_refs = refs[:-2]  # bf16 weights, one per layer

        x = x_ref[...]  # f32 activations
        for i in range(n_layers):
            w = w_refs[i][...]  # bf16 (Din, Dout)
            # MXU matmul: bf16 x bf16 -> f32 accumulate.
            y = jnp.dot(
                x.astype(jnp.bfloat16), w, preferred_element_type=jnp.float32
            )
            if i < n_layers - 1:
                # BatchNorm1d (training mode): batch mean & biased variance.
                # Hidden-layer Linear bias omitted: cancelled exactly by the
                # mean subtraction (gamma=1, beta=0).
                mean = jnp.mean(y, axis=0, keepdims=True)
                centered = y - mean
                var = jnp.mean(centered * centered, axis=0, keepdims=True)
                y_hat = centered * jax.lax.rsqrt(var + BN_EPS)
                # LeakyReLU(0.2): max(y, 0.2*y) since 0 < slope < 1.
                x = jnp.maximum(y_hat, LEAKY_SLOPE * y_hat)
            else:
                # Final: bias + Sigmoid (f32, EUP).
                x = jax.nn.sigmoid(y + b_final_ref[...])

        o_ref[...] = x

    return kernel


def generator_forward(latent, weights, final_bias):
    """Single fused, grid-less pallas_call over the whole generator."""
    latent = latent.astype(jnp.float32)
    B, d_in0 = latent.shape
    n_layers = len(weights)
    d_out_final = weights[-1].shape[1]

    # Full-array BlockSpecs (no grid): everything resident in VMEM for the
    # single invocation.
    in_specs = [pl.BlockSpec((B, d_in0), lambda: (0, 0))]
    flat_args = [latent]
    for w in weights:
        din, dout = w.shape
        in_specs.append(pl.BlockSpec((din, dout), lambda: (0, 0)))
        flat_args.append(w)
    in_specs.append(pl.BlockSpec((1, d_out_final), lambda: (0, 0)))
    flat_args.append(final_bias)

    # Advisory cost estimate (scheduling hint only).
    flops = 0
    bytes_accessed = latent.size * 4 + B * d_out_final * 4 + final_bias.size * 4
    for w in weights:
        din, dout = w.shape
        flops += 2 * B * din * dout + 6 * B * dout
        bytes_accessed += w.size * 2  # bf16 weights
    transcendentals = B * d_out_final + sum(w.shape[1] for w in weights[:-1])

    return pl.pallas_call(
        _make_fused_kernel(n_layers),
        out_shape=jax.ShapeDtypeStruct((B, d_out_final), jnp.float32),
        in_specs=in_specs,
        out_specs=pl.BlockSpec((B, d_out_final), lambda: (0, 0)),
        cost_estimate=pl.CostEstimate(
            flops=flops,
            transcendentals=transcendentals,
            bytes_accessed=bytes_accessed,
        ),
    )(*flat_args)


# ----------------------------------------------------------------------------
# Parameter init (matches torch.nn.Linear default U(-1/sqrt(fan_in), +...)).
# Weights stored as (d_in, d_out) bf16 (PyTorch (d_out, d_in) transposed);
# only the final layer carries a bias (hidden biases are cancelled by BN).
# ----------------------------------------------------------------------------
def init_generator_params(key, latent_dim, im_size, hidden_dim):
    im_flatten = 1
    for s in im_size:
        im_flatten *= s
    dims = [latent_dim] + list(hidden_dim) + [im_flatten]
    weights = []
    for d_in, d_out in zip(dims[:-1], dims[1:]):
        key, kw = jax.random.split(key)
        bound = 1.0 / math.sqrt(d_in)
        w = jax.random.uniform(kw, (d_in, d_out), jnp.float32, -bound, bound)
        weights.append(w.astype(jnp.bfloat16))
    key, kb = jax.random.split(key)
    bound = 1.0 / math.sqrt(dims[-2])
    final_bias = jax.random.uniform(
        kb, (1, im_flatten), jnp.float32, -bound, bound
    )
    return weights, final_bias


# ----------------------------------------------------------------------------
# Pure-JAX reference with the same numerics (bf16 MXU operands, f32 math).
# Matches PyTorch (training-mode) forward up to bf16-matmul precision.
# ----------------------------------------------------------------------------
def generator_reference(latent, weights, final_bias):
    x = latent.astype(jnp.float32)
    n = len(weights)
    for i, w in enumerate(weights):
        y = jnp.dot(
            x.astype(jnp.bfloat16),
            w.astype(jnp.bfloat16),
            preferred_element_type=jnp.float32,
        )
        if i < n - 1:
            mean = jnp.mean(y, axis=0, keepdims=True)
            centered = y - mean
            var = jnp.mean(centered * centered, axis=0, keepdims=True)
            y_hat = centered * jax.lax.rsqrt(var + BN_EPS)
            x = jnp.maximum(y_hat, LEAKY_SLOPE * y_hat)
        else:
            x = jax.nn.sigmoid(y + final_bias)
    return x


# ----------------------------------------------------------------------------
if __name__ == "__main__":
    # Shapes consistent with the module; batch raised to 128 so the MXU sees
    # a full pass and the (fixed) launch/DMA overhead is amortized.
    batch = 128
    latent_dim = 32
    hidden_dim = (64, 128)
    im_size = (1, 16, 16)  # im_flatten = 256

    key = jax.random.PRNGKey(0)
    key, klat = jax.random.split(key)
    latent = jax.random.normal(klat, (batch, latent_dim), jnp.float32)

    weights, final_bias = init_generator_params(
        key, latent_dim, im_size, hidden_dim
    )

    out = generator_forward(latent, weights, final_bias)
    out = jax.block_until_ready(out)

    expected_shape = (batch, 1 * 16 * 16)
    assert out.shape == expected_shape, out.shape
    assert bool(jnp.all(jnp.isfinite(out)))
    assert bool(jnp.all((out >= 0.0) & (out <= 1.0)))  # sigmoid output range

    ref = generator_reference(latent, weights, final_bias)
    assert bool(jnp.allclose(out, ref, rtol=1e-3, atol=1e-3)), float(
        jnp.max(jnp.abs(out - ref))
    )

    print("KERNEL_OK")
</pallas_src>

<mosaic_0001>
module attributes {stable_mosaic.version = 11 : i64} {
  func.func @kernel(%arg0: memref<128x32xf32, #tpu.memory_space<vmem>>, %arg1: memref<32x64xbf16, #tpu.memory_space<vmem>>, %arg2: memref<64x128xbf16, #tpu.memory_space<vmem>>, %arg3: memref<128x256xbf16, #tpu.memory_space<vmem>>, %arg4: memref<1x256xf32, #tpu.memory_space<vmem>>, %arg5: memref<128x256xf32, #tpu.memory_space<vmem>>) attributes {dimension_semantics = [], scalar_prefetch = 0 : i64, scratch_operands = 0 : i64, tpu.core_type = #tpu.core_type<tc>} {
    %c0 = arith.constant 0 : index
    %c0_0 = arith.constant 0 : index
    %0 = vector.load %arg0[%c0, %c0_0] : memref<128x32xf32, #tpu.memory_space<vmem>>, vector<128x32xf32>
    %c0_1 = arith.constant 0 : index
    %c0_2 = arith.constant 0 : index
    %1 = vector.load %arg1[%c0_1, %c0_2] : memref<32x64xbf16, #tpu.memory_space<vmem>>, vector<32x64xbf16>
    %2 = arith.truncf %0 : vector<128x32xf32> to vector<128x32xbf16>
    %cst = arith.constant dense<0.000000e+00> : vector<128x64xf32>
    %3 = tpu.matmul %2, %1, %cst {dimension_numbers = #tpu.dot_dimension_numbers<[1], [0], [0], [1], [0, 0, 1, 1], [], []>} : vector<128x32xbf16>, vector<32x64xbf16>, vector<128x64xf32> -> vector<128x64xf32>
    %cst_3 = arith.constant dense<0.000000e+00> : vector<64xf32>
    %4 = vector.multi_reduction <add>, %3, %cst_3 [0] : vector<128x64xf32> to vector<64xf32>
    %5 = vector.shape_cast %4 : vector<64xf32> to vector<1x64xf32>
    %cst_4 = arith.constant 1.280000e+02 : f32
    %6 = vector.broadcast %cst_4 : f32 to vector<1x64xf32>
    %7 = arith.divf %5, %6 : vector<1x64xf32>
    %8 = vector.broadcast %7 : vector<1x64xf32> to vector<128x64xf32>
    %9 = arith.subf %3, %8 : vector<128x64xf32>
    %10 = arith.mulf %9, %9 : vector<128x64xf32>
    %cst_5 = arith.constant dense<0.000000e+00> : vector<64xf32>
    %11 = vector.multi_reduction <add>, %10, %cst_5 [0] : vector<128x64xf32> to vector<64xf32>
    %12 = vector.shape_cast %11 : vector<64xf32> to vector<1x64xf32>
    %cst_6 = arith.constant 1.280000e+02 : f32
    %13 = vector.broadcast %cst_6 : f32 to vector<1x64xf32>
    %14 = arith.divf %12, %13 : vector<1x64xf32>
    %cst_7 = arith.constant 9.99999974E-6 : f32
    %15 = vector.broadcast %cst_7 : f32 to vector<1x64xf32>
    %16 = arith.addf %14, %15 : vector<1x64xf32>
    %17 = math.rsqrt %16 : vector<1x64xf32>
    %18 = vector.broadcast %17 : vector<1x64xf32> to vector<128x64xf32>
    %19 = arith.mulf %9, %18 : vector<128x64xf32>
    %cst_8 = arith.constant 2.000000e-01 : f32
    %20 = vector.broadcast %cst_8 : f32 to vector<128x64xf32>
    %21 = arith.mulf %20, %19 : vector<128x64xf32>
    %22 = arith.maximumf %19, %21 : vector<128x64xf32>
    %c0_9 = arith.constant 0 : index
    %c0_10 = arith.constant 0 : index
    %23 = vector.load %arg2[%c0_9, %c0_10] : memref<64x128xbf16, #tpu.memory_space<vmem>>, vector<64x128xbf16>
    %24 = arith.truncf %22 : vector<128x64xf32> to vector<128x64xbf16>
    %cst_11 = arith.constant dense<0.000000e+00> : vector<128x128xf32>
    %25 = tpu.matmul %24, %23, %cst_11 {dimension_numbers = #tpu.dot_dimension_numbers<[1], [0], [0], [1], [0, 0, 1, 1], [], []>} : vector<128x64xbf16>, vector<64x128xbf16>, vector<128x128xf32> -> vector<128x128xf32>
    %cst_12 = arith.constant dense<0.000000e+00> : vector<128xf32>
    %26 = vector.multi_reduction <add>, %25, %cst_12 [0] : vector<128x128xf32> to vector<128xf32>
    %27 = vector.shape_cast %26 : vector<128xf32> to vector<1x128xf32>
    %cst_13 = arith.constant 1.280000e+02 : f32
    %28 = vector.broadcast %cst_13 : f32 to vector<1x128xf32>
    %29 = arith.divf %27, %28 : vector<1x128xf32>
    %30 = vector.broadcast %29 : vector<1x128xf32> to vector<128x128xf32>
    %31 = arith.subf %25, %30 : vector<128x128xf32>
    %32 = arith.mulf %31, %31 : vector<128x128xf32>
    %cst_14 = arith.constant dense<0.000000e+00> : vector<128xf32>
    %33 = vector.multi_reduction <add>, %32, %cst_14 [0] : vector<128x128xf32> to vector<128xf32>
    %34 = vector.shape_cast %33 : vector<128xf32> to vector<1x128xf32>
    %cst_15 = arith.constant 1.280000e+02 : f32
    %35 = vector.broadcast %cst_15 : f32 to vector<1x128xf32>
    %36 = arith.divf %34, %35 : vector<1x128xf32>
    %cst_16 = arith.constant 9.99999974E-6 : f32
    %37 = vector.broadcast %cst_16 : f32 to vector<1x128xf32>
    %38 = arith.addf %36, %37 : vector<1x128xf32>
    %39 = math.rsqrt %38 : vector<1x128xf32>
    %40 = vector.broadcast %39 : vector<1x128xf32> to vector<128x128xf32>
    %41 = arith.mulf %31, %40 : vector<128x128xf32>
    %cst_17 = arith.constant 2.000000e-01 : f32
    %42 = vector.broadcast %cst_17 : f32 to vector<128x128xf32>
    %43 = arith.mulf %42, %41 : vector<128x128xf32>
    %44 = arith.maximumf %41, %43 : vector<128x128xf32>
    %c0_18 = arith.constant 0 : index
    %c0_19 = arith.constant 0 : index
    %45 = vector.load %arg3[%c0_18, %c0_19] : memref<128x256xbf16, #tpu.memory_space<vmem>>, vector<128x256xbf16>
    %46 = arith.truncf %44 : vector<128x128xf32> to vector<128x128xbf16>
    %cst_20 = arith.constant dense<0.000000e+00> : vector<128x256xf32>
    %47 = tpu.matmul %46, %45, %cst_20 {dimension_numbers = #tpu.dot_dimension_numbers<[1], [0], [0], [1], [0, 0, 1, 1], [], []>} : vector<128x128xbf16>, vector<128x256xbf16>, vector<128x256xf32> -> vector<128x256xf32>
    %c0_21 = arith.constant 0 : index
    %c0_22 = arith.constant 0 : index
    %48 = vector.load %arg4[%c0_21, %c0_22] : memref<1x256xf32, #tpu.memory_space<vmem>>, vector<1x256xf32>
    %49 = vector.broadcast %48 : vector<1x256xf32> to vector<128x256xf32>
    %50 = arith.addf %47, %49 : vector<128x256xf32>
    %51 = arith.negf %50 : vector<128x256xf32>
    %52 = math.exp %51 : vector<128x256xf32>
    %cst_23 = arith.constant 1.000000e+00 : f32
    %53 = vector.broadcast %cst_23 : f32 to vector<128x256xf32>
    %54 = arith.addf %53, %52 : vector<128x256xf32>
    %55 = arith.divf %53, %54 : vector<128x256xf32>
    %c0_24 = arith.constant 0 : index
    %c0_25 = arith.constant 0 : index
    %56 = vector.load %arg5[%c0_24, %c0_25] : memref<128x256xf32, #tpu.memory_space<vmem>>, vector<128x256xf32>
    tpu.vector_store %arg5[%c0_24, %c0_25], %55 {strides = array<i32>} : memref<128x256xf32, #tpu.memory_space<vmem>>, vector<128x256xf32>,
    return
  }
}

</mosaic_0001>

<bundles_post_ra>
// kernel: tpu_custom_call.1
= control target key start
LH: loop header
LB: loop body
LE: loop exit
PB: predicated region body
PF: predicated region fallthrough
CT: control target
= control target key end

     0   :  { %10 = vsyncpa [#allocation3], 0  ;;  %s2682_s0 = inlined_call_operand.vmem [shape: f32[128,32], index: 0, kind: input, shape index: {}]   ;;  %s2683_s1 = inlined_call_operand.hbm [shape: bf16[32,64], index: 1, kind: input, shape index: {}]   ;;  %s2684_s2 = inlined_call_operand.vmem [shape: bf16[64,128], index: 2, kind: input, shape index: {}]   ;;  %s2685_s3 = inlined_call_operand.vmem [shape: bf16[128,256], index: 3, kind: input, shape index: {}]   ;;  %s2686_s4 = inlined_call_operand.vmem [shape: f32[1,256], index: 4, kind: input, shape index: {}]   ;;  %s2687_s5 = inlined_call_operand.hbm [shape: f32[128,256], index: 5, kind: output, shape index: {}]  }
   0x1   :  { %11 = vsyncpa [#allocation4], 0  ;;  %s18_s20 = sshll.u32 %s2683_s1, 4  ;;  %s1793_s21 = smov [#allocation2]   ;;  %s19_s20 = int_to_ptr.hbm [resolvable:$true] %s18_s20 }
   0x2   :  { %s20_s22 = sshll.u32 %s1793_s21, 4  ;;  %s1794_s23 = smov 64   ;;  %s21_s22 = int_to_ptr.vmem [resolvable:$true] %s20_s22 }
   0x3   :  { %s1795_s24 = smov 4  }
   0x4   :  { %26 = dma.hbm_to_vmem [thread:$0]  %s19_s20, 256, %s21_s22, [#allocation3], %s1794_s23, %s1794_s23, %s1795_s24  }
   0x5   :  { %1789 = dma.done.wait [#allocation3], 256  }
   0x6   :  { %1790 = vsyncadd [#allocation3], 4294967040  ;;  %v1579_v0 = vld [vmem:[#allocation2 + $0x8] sm:$0xff]  ;;  %v1578_v1 = vld [vmem:[#allocation2] sm:$0xff]  ;;  %vm78_vm0 = vcmask 261120   ;;  %vm152_vm1 = vcmask 523264  }
   0x7   :  { %109 = vmatpush.bf16.msra.mxu0 %v1579_v0  ;;  %v38_v2 = vld [vmem:[%s2682_s0] sm:$0xff]  ;;  %v39_v3 = vld [vmem:[%s2682_s0 + $0x8] sm:$0xff]  ;;  %v40_v5 = vld [vmem:[%s2682_s0 + $0x10] sm:$0xff]  ;;  %v1796_v58 = vmov 128.0   ;;  %s1429_s23 = sshll.u32 %s2687_s5, 4  ;;  %s1798_s24 = smov 256   ;;  %s1430_s23 = int_to_ptr.hbm [resolvable:$true] %s1429_s23 }
   0x8   :  { %v58_v4 = vpack.c.bf16 %v39_v3, %v38_v2  ;;  %v41_v6 = vld [vmem:[%s2682_s0 + $0x18] sm:$0xff]  ;;  %v42_v8 = vld [vmem:[%s2682_s0 + $0x20] sm:$0xff]  ;;  %v43_v9 = vld [vmem:[%s2682_s0 + $0x28] sm:$0xff]  ;;  %1607 = vrcp.f32 %v1796_v58  ;;  %s1799_s25 = smov 16  }
   0x9   :  { %v59_v7 = vpack.c.bf16 %v41_v6, %v40_v5  ;;  %v60_v10 = vpack.c.bf16 %v43_v9, %v42_v8  ;;  %v44_v11 = vld [vmem:[%s2682_s0 + $0x30] sm:$0xff]  ;;  %v45_v12 = vld [vmem:[%s2682_s0 + $0x38] sm:$0xff]  ;;  %v46_v14 = vld [vmem:[%s2682_s0 + $0x40] sm:$0xff] }
   0xa   :  { %v61_v13 = vpack.c.bf16 %v45_v12, %v44_v11  ;;  %v47_v15 = vld [vmem:[%s2682_s0 + $0x48] sm:$0xff]  ;;  %v48_v17 = vld [vmem:[%s2682_s0 + $0x50] sm:$0xff]  ;;  %v49_v18 = vld [vmem:[%s2682_s0 + $0x58] sm:$0xff] }
   0xb   :  { %110 = vmatpush.bf16.msra.mxu0 %v1578_v1  ;;  %v62_v16 = vpack.c.bf16 %v47_v15, %v46_v14  ;;  %v63_v19 = vpack.c.bf16 %v49_v18, %v48_v17  ;;  %v50_v20 = vld [vmem:[%s2682_s0 + $0x60] sm:$0xff]  ;;  %v51_v21 = vld [vmem:[%s2682_s0 + $0x68] sm:$0xff]  ;;  %v52_v23 = vld [vmem:[%s2682_s0 + $0x70] sm:$0xff] }
   0xc   :  { %v64_v22 = vpack.c.bf16 %v51_v21, %v50_v20  ;;  %v53_v24 = vld [vmem:[%s2682_s0 + $0x78] sm:$0xff] }
   0xd   :  { %v65_v25 = vpack.c.bf16 %v53_v24, %v52_v23 }
   0xe   :  { %1450 = vmatmul.msk.bf16.vlgmr.msra.gmra.mxu0 %vm78_vm0, %v58_v4  ;;  %v1608_v1 = vpop.eup %1607 }
   0xf   :  { %v191_v6 = vmul.f32 128.0, %v1608_v1  ;;  %vm195_vm2 = vweird.f32 %v1608_v1 }
  0x11   :  { %v192_v11 = vsub.f32 1.0, %v191_v6 }
  0x13   :  { %v193_v14 = vmul.f32 %v1608_v1, %v192_v11 }
  0x15   :  { %v194_v17 = vadd.f32 %v1608_v1, %v193_v14 }
  0x17   :  { %v1953_v20 = vsel %vm195_vm2, %v1608_v1, %v194_v17 }
  0x1e   :  { %1451 = vmatmul.msk.bf16.gmra.mxu0 %vm78_vm0, %v59_v7 }
  0x2e   :  { %1452 = vmatmul.msk.bf16.gmra.mxu0 %vm78_vm0, %v60_v10 }
  0x3e   :  { %1453 = vmatmul.msk.bf16.gmra.mxu0 %vm78_vm0, %v61_v13 }
  0x4e   :  { %1454 = vmatmul.msk.bf16.gmra.mxu0 %vm78_vm0, %v62_v16 }
  0x5e   :  { %1455 = vmatmul.msk.bf16.gmra.mxu0 %vm78_vm0, %v63_v19 }
  0x6e   :  { %1456 = vmatmul.msk.bf16.gmra.mxu0 %vm78_vm0, %v64_v22 }
  0x7e   :  { %1457 = vmatmul.msk.bf16.gmra.mxu0 %vm78_vm0, %v65_v25 }
  0x8b   :  { %v1889_v26 = vpop.f32.mrf.mxu0 }
  0x8c   :  { %v153_v39 = vsel %vm152_vm1, %v1889_v26, 0.0 }
  0x93   :  { %v1891_v27 = vpop.f32.mrf.mxu0 }
  0x94   :  { %v154_v38 = vsel %vm152_vm1, %v1891_v27, 0.0 }
  0x95   :  { %v155_v41 = vadd.f32 %v154_v38, %v153_v39 }
  0x9b   :  { %v1893_v28 = vpop.f32.mrf.mxu0 }
  0x9c   :  { %v156_v40 = vsel %vm152_vm1, %v1893_v28, 0.0 }
  0x9d   :  { %v157_v43 = vadd.f32 %v156_v40, %v155_v41 }
  0xa3   :  { %v1895_v29 = vpop.f32.mrf.mxu0 }
  0xa4   :  { %v158_v42 = vsel %vm152_vm1, %v1895_v29, 0.0 }
  0xa5   :  { %v159_v46 = vadd.f32 %v158_v42, %v157_v43 }
  0xab   :  { %v1897_v30 = vpop.f32.mrf.mxu0 }
  0xac   :  { %v160_v45 = vsel %vm152_vm1, %v1897_v30, 0.0 }
  0xad   :  { %v161_v48 = vadd.f32 %v160_v45, %v159_v46 }
  0xb3   :  { %v1899_v31 = vpop.f32.mrf.mxu0 }
  0xb4   :  { %v162_v47 = vsel %vm152_vm1, %v1899_v31, 0.0 }
  0xb5   :  { %v163_v50 = vadd.f32 %v162_v47, %v161_v48 }
  0xbb   :  { %v1901_v32 = vpop.f32.mrf.mxu0 }
  0xbc   :  { %v164_v49 = vsel %vm152_vm1, %v1901_v32, 0.0 }
  0xbd   :  { %v165_v52 = vadd.f32 %v164_v49, %v163_v50 }
  0xc3   :  { %v1903_v33 = vpop.f32.mrf.mxu0 }
  0xc4   :  { %v166_v51 = vsel %vm152_vm1, %v1903_v33, 0.0 }
  0xc5   :  { %v167_v55 = vadd.f32 %v166_v51, %v165_v52 }
  0xcb   :  { %v1905_v34 = vpop.f32.mrf.mxu0 }
  0xcc   :  { %v168_v54 = vsel %vm152_vm1, %v1905_v34, 0.0 }
  0xcd   :  { %v169_v57 = vadd.f32 %v168_v54, %v167_v55 }
  0xd3   :  { %v1907_v35 = vpop.f32.mrf.mxu0 }
  0xd4   :  { %v170_v56 = vsel %vm152_vm1, %v1907_v35, 0.0 }
  0xd5   :  { %v171_v60 = vadd.f32 %v170_v56, %v169_v57 }
  0xdb   :  { %v1909_v36 = vpop.f32.mrf.mxu0 }
  0xdc   :  { %v172_v59 = vsel %vm152_vm1, %v1909_v36, 0.0 }
  0xdd   :  { %v173_v62 = vadd.f32 %v172_v59, %v171_v60 }
  0xe3   :  { %v1911_v37 = vpop.f32.mrf.mxu0 }
  0xe4   :  { %v174_v61 = vsel %vm152_vm1, %v1911_v37, 0.0 }
  0xe5   :  { %v175_v2 = vadd.f32 %v174_v61, %v173_v62 }
  0xeb   :  { %v1921_v44 = vpop.f32.mrf.mxu0 }
  0xec   :  { %v176_v0 = vsel %vm152_vm1, %v1921_v44, 0.0 }
  0xed   :  { %v177_v4 = vadd.f32 %v176_v0, %v175_v2 }
  0xf3   :  { %v1931_v53 = vpop.f32.mrf.mxu0 }
  0xf4   :  { %v178_v3 = vsel %vm152_vm1, %v1931_v53, 0.0 }
  0xf5   :  { %v179_v7 = vadd.f32 %v178_v3, %v177_v4 }
  0xfb   :  { %v1941_v63 = vpop.f32.mrf.mxu0 }
  0xfc   :  { %v180_v5 = vsel %vm152_vm1, %v1941_v63, 0.0 }
  0xfd   :  { %v181_v8 = vadd.f32 %v180_v5, %v179_v7 }
 0x103   :  { %v1949_v9 = vpop.f32.mrf.mxu0 }
 0x104   :  { %v182_v10 = vsel %vm152_vm1, %v1949_v9, 0.0 }
 0x105   :  { %v183_v12 = vadd.f32 %v182_v10, %v181_v8 }
 0x107   :  { %v184_v13 = vrot.slane %v183_v12, 4 }
 0x109   :  { %v185_v15 = vadd.f32 %v184_v13, %v183_v12 }
 0x10b   :  { %v186_v16 = vrot.slane %v185_v15, 2 }
 0x10d   :  { %v187_v18 = vadd.f32 %v186_v16, %v185_v15 }
 0x10f   :  { %v188_v19 = vrot.slane %v187_v18, 1 }
 0x111   :  { %v189_v21 = vadd.f32 %v188_v19, %v187_v18 }
 0x113   :  { %v197_v22 = vmul.f32 %v1953_v20, %v189_v21 }
 0x115   :  { %v1957_v23 = vsub.f32 %v1889_v26, %v197_v22  ;;  %v1960_v24 = vsub.f32 %v1891_v27, %v197_v22  ;;  %v1963_v25 = vsub.f32 %v1893_v28, %v197_v22  ;;  %v1966_v38 = vsub.f32 %v1895_v29, %v197_v22 }
 0x116   :  { %v1973_v41 = vsub.f32 %v1897_v30, %v197_v22  ;;  %v1978_v27 = vsub.f32 %v1899_v31, %v197_v22  ;;  %v1985_v45 = vsub.f32 %v1901_v32, %v197_v22  ;;  %v1991_v31 = vsub.f32 %v1903_v33, %v197_v22 }
 0x117   :  { %v214_v39 = vmul.f32 %v1957_v23, %v1957_v23  ;;  %v215_v40 = vmul.f32 %v1960_v24, %v1960_v24  ;;  %v216_v26 = vmul.f32 %v1963_v25, %v1963_v25  ;;  %v217_v28 = vmul.f32 %v1966_v38, %v1966_v38 }
 0x118   :  { %v218_v30 = vmul.f32 %v1973_v41, %v1973_v41  ;;  %v219_v48 = vmul.f32 %v1978_v27, %v1978_v27  ;;  %v1997_v51 = vsub.f32 %v1905_v34, %v197_v22  ;;  %v220_v32 = vmul.f32 %v1985_v45, %v1985_v45 }
 0x119   :  { %v230_v29 = vsel %vm152_vm1, %v214_v39, 0.0  ;;  %v231_v42 = vsel %vm152_vm1, %v215_v40, 0.0  ;;  %v233_v46 = vsel %vm152_vm1, %v216_v26, 0.0  ;;  %v235_v49 = vsel %vm152_vm1, %v217_v28, 0.0  ;;  %v1582_v26 = vld [vmem:[%s2684_s2 + $0x10] sm:$0xff] }
 0x11a   :  { %v232_v43 = vadd.f32 %v231_v42, %v230_v29  ;;  %v237_v52 = vsel %vm152_vm1, %v218_v30, 0.0  ;;  %v2003_v55 = vsub.f32 %v1907_v35, %v197_v22  ;;  %v221_v33 = vmul.f32 %v1991_v31, %v1991_v31  ;;  %v1581_v42 = vld [vmem:[%s2684_s2 + $0x8] sm:$0xff]  ;;  %v1580_v30 = vld [vmem:[%s2684_s2] sm:$0xff] }
 0x11b   :  { %v239_v56 = vsel %vm152_vm1, %v219_v48, 0.0  ;;  %v2009_v58 = vsub.f32 %v1909_v36, %v197_v22  ;;  %v222_v34 = vmul.f32 %v1997_v51, %v1997_v51  ;;  %v241_v59 = vsel %vm152_vm1, %v220_v32, 0.0 }
 0x11c   :  { %v234_v47 = vadd.f32 %v233_v46, %v232_v43  ;;  %v2015_v61 = vsub.f32 %v1911_v37, %v197_v22  ;;  %v223_v35 = vmul.f32 %v2003_v55, %v2003_v55  ;;  %v243_v62 = vsel %vm152_vm1, %v221_v33, 0.0 }
 0x11d   :  { %v2021_v1 = vsub.f32 %v1921_v44, %v197_v22  ;;  %v224_v36 = vmul.f32 %v2009_v58, %v2009_v58  ;;  %v245_v2 = vsel %vm152_vm1, %v222_v34, 0.0  ;;  %v2027_v4 = vsub.f32 %v1931_v53, %v197_v22 }
 0x11e   :  { %v236_v50 = vadd.f32 %v235_v49, %v234_v47  ;;  %v225_v37 = vmul.f32 %v2015_v61, %v2015_v61  ;;  %v247_v5 = vsel %vm152_vm1, %v223_v35, 0.0  ;;  %v2033_v7 = vsub.f32 %v1941_v63, %v197_v22 }
 0x11f   :  { %v226_v44 = vmul.f32 %v2021_v1, %v2021_v1  ;;  %v249_v8 = vsel %vm152_vm1, %v224_v36, 0.0  ;;  %v2039_v11 = vsub.f32 %v1949_v9, %v197_v22  ;;  %v227_v53 = vmul.f32 %v2027_v4, %v2027_v4  ;;  %v1583_v22 = vld [vmem:[%s2684_s2 + $0x18] sm:$0xff] }
 0x120   :  { %v238_v54 = vadd.f32 %v237_v52, %v236_v50  ;;  %v251_v12 = vsel %vm152_vm1, %v225_v37, 0.0  ;;  %v228_v14 = vmul.f32 %v2033_v7, %v2033_v7  ;;  %395 = vmatpush.bf16.msra.mxu1 %v1583_v22 }
 0x121   :  { %v253_v63 = vsel %vm152_vm1, %v226_v44, 0.0  ;;  %v229_v16 = vmul.f32 %v2039_v11, %v2039_v11  ;;  %v255_v17 = vsel %vm152_vm1, %v227_v53, 0.0 }
 0x122   :  { %v240_v57 = vadd.f32 %v239_v56, %v238_v54  ;;  %v257_v9 = vsel %vm152_vm1, %v228_v14, 0.0 }
 0x123   :  { %v259_v21 = vsel %vm152_vm1, %v229_v16, 0.0 }
 0x124   :  { %v242_v60 = vadd.f32 %v241_v59, %v240_v57  ;;  %396 = vmatpush.bf16.msra.mxu1 %v1582_v26 }
 0x126   :  { %v244_v0 = vadd.f32 %v243_v62, %v242_v60 }
 0x128   :  { %v246_v3 = vadd.f32 %v245_v2, %v244_v0  ;;  %397 = vmatpush.bf16.msra.mxu1 %v1581_v42 }
 0x12a   :  { %v248_v6 = vadd.f32 %v247_v5, %v246_v3 }
 0x12c   :  { %v250_v10 = vadd.f32 %v249_v8, %v248_v6  ;;  %398 = vmatpush.bf16.msra.mxu1 %v1580_v30 }
 0x12e   :  { %v252_v13 = vadd.f32 %v251_v12, %v250_v10 }
 0x130   :  { %v254_v15 = vadd.f32 %v253_v63, %v252_v13 }
 0x132   :  { %v256_v18 = vadd.f32 %v255_v17, %v254_v15 }
 0x134   :  { %v258_v19 = vadd.f32 %v257_v9, %v256_v18 }
 0x136   :  { %v260_v39 = vadd.f32 %v259_v21, %v258_v19 }
 0x138   :  { %v261_v40 = vrot.slane %v260_v39, 4 }
 0x13a   :  { %v262_v28 = vadd.f32 %v261_v40, %v260_v39 }
 0x13c   :  { %v263_v29 = vrot.slane %v262_v28, 2 }
 0x13e   :  { %v264_v43 = vadd.f32 %v263_v29, %v262_v28 }
 0x140   :  { %v265_v46 = vrot.slane %v264_v43, 1 }
 0x142   :  { %v266_v47 = vadd.f32 %v265_v46, %v264_v43 }
 0x144   :  { %v267_v48 = vmul.f32 %v266_v47, %v1953_v20 }
 0x146   :  { %v268_v49 = vadd.f32 1e-05, %v267_v48 }
 0x148   :  { %1609 = vrsqrt.f32 %v268_v49  ;;  %vm275_vm4 = vweird.f32 %v268_v49 }
 0x14e   :  { %v1610_v50 = vpop.eup %1609 }
 0x14f   :  { %v270_v32 = vmul.f32 %v1610_v50, %v268_v49  ;;  %vm276_vm3 = vweird.f32 %v1610_v50 }
 0x150   :  { %vm277_vm5 = vmor %vm275_vm4, %vm276_vm3 }
 0x151   :  { %v271_v52 = vmul.f32 %v1610_v50, %v270_v32 }
 0x153   :  { %v272_v54 = vmul.f32 0.5, %v271_v52 }
 0x155   :  { %v273_v33 = vsub.f32 1.5, %v272_v54 }
 0x157   :  { %v274_v56 = vmul.f32 %v1610_v50, %v273_v33 }
 0x159   :  { %v278_v57 = vsel %vm277_vm5, %v1610_v50, %v274_v56 }
 0x15a   :  { %v279_v34 = vmul.f32 %v278_v57, %v1957_v23  ;;  %v280_v59 = vmul.f32 %v278_v57, %v1960_v24  ;;  %v281_v2 = vmul.f32 %v278_v57, %v1963_v25  ;;  %v282_v3 = vmul.f32 %v278_v57, %v1966_v38 }
 0x15b   :  { %v283_v23 = vmul.f32 %v278_v57, %v1973_v41  ;;  %v284_v24 = vmul.f32 %v278_v57, %v1978_v27  ;;  %v285_v25 = vmul.f32 %v278_v57, %v1985_v45  ;;  %v286_v38 = vmul.f32 %v278_v57, %v1991_v31 }
 0x15c   :  { %v295_v60 = vmul.f32 0.2, %v279_v34  ;;  %v296_v35 = vmul.f32 0.2, %v280_v59  ;;  %v297_v37 = vmul.f32 0.2, %v281_v2  ;;  %v287_v41 = vmul.f32 %v278_v57, %v1997_v51 }
 0x15d   :  { %v298_v5 = vmul.f32 0.2, %v282_v3  ;;  %v299_v10 = vmul.f32 0.2, %v283_v23  ;;  %v300_v53 = vmul.f32 0.2, %v284_v24  ;;  %v288_v27 = vmul.f32 %v278_v57, %v2003_v55 }
 0x15e   :  { %v311_v62 = vmax.f32 %v279_v34, %v295_v60  ;;  %v312_v0 = vmax.f32 %v280_v59, %v296_v35  ;;  %v313_v6 = vmax.f32 %v281_v2, %v297_v37  ;;  %v301_v63 = vmul.f32 0.2, %v285_v25 }
 0x15f   :  { %v314_v44 = vmax.f32 %v282_v3, %v298_v5  ;;  %v315_v12 = vmax.f32 %v283_v23, %v299_v10  ;;  %v316_v13 = vmax.f32 %v284_v24, %v300_v53  ;;  %v302_v15 = vmul.f32 0.2, %v286_v38 }
 0x160   :  { %v335_v36 = vpack.c.bf16 %v312_v0, %v311_v62  ;;  %v317_v16 = vmax.f32 %v285_v25, %v301_v63  ;;  %v303_v9 = vmul.f32 0.2, %v287_v41  ;;  %v304_v19 = vmul.f32 0.2, %v288_v27 }
 0x161   :  { %v336_v8 = vpack.c.bf16 %v314_v44, %v313_v6  ;;  %v337_v14 = vpack.c.bf16 %v316_v13, %v315_v12  ;;  %v318_v17 = vmax.f32 %v286_v38, %v302_v15  ;;  %v289_v45 = vmul.f32 %v278_v57, %v2009_v58 }
 0x162   :  { %1474 = vmatmul.msk.bf16.vlgmr.msra.gmra.mxu1 %vm152_vm1, %v335_v36  ;;  %v319_v21 = vmax.f32 %v287_v41, %v303_v9  ;;  %v320_v22 = vmax.f32 %v288_v27, %v304_v19  ;;  %v290_v31 = vmul.f32 %v278_v57, %v2015_v61  ;;  %v291_v51 = vmul.f32 %v278_v57, %v2021_v1 }
 0x163   :  { %v338_v18 = vpack.c.bf16 %v318_v17, %v317_v16  ;;  %v305_v40 = vmul.f32 0.2, %v289_v45  ;;  %v292_v55 = vmul.f32 %v278_v57, %v2027_v4  ;;  %v294_v58 = vmul.f32 %v278_v57, %v2039_v11 }
 0x164   :  { %v339_v39 = vpack.c.bf16 %v320_v22, %v319_v21  ;;  %v306_v26 = vmul.f32 0.2, %v290_v31  ;;  %v307_v43 = vmul.f32 0.2, %v291_v51  ;;  %v293_v61 = vmul.f32 %v278_v57, %v2033_v7 }
 0x165   :  { %v321_v28 = vmax.f32 %v289_v45, %v305_v40  ;;  %v308_v30 = vmul.f32 0.2, %v292_v55  ;;  %v310_v49 = vmul.f32 0.2, %v294_v58 }
 0x166   :  { %v322_v29 = vmax.f32 %v290_v31, %v306_v26  ;;  %v323_v46 = vmax.f32 %v291_v51, %v307_v43  ;;  %v309_v50 = vmul.f32 0.2, %v293_v61 }
 0x167   :  { %v324_v47 = vmax.f32 %v292_v55, %v308_v30  ;;  %v326_v32 = vmax.f32 %v294_v58, %v310_v49 }
 0x168   :  { %v340_v42 = vpack.c.bf16 %v322_v29, %v321_v28  ;;  %v325_v52 = vmax.f32 %v293_v61, %v309_v50 }
 0x169   :  { %v341_v48 = vpack.c.bf16 %v324_v47, %v323_v46 }
 0x16a   :  { %v342_v54 = vpack.c.bf16 %v326_v32, %v325_v52 }
 0x172   :  { %1475 = vmatmul.msk.bf16.gmra.mxu1 %vm152_vm1, %v336_v8 }
 0x182   :  { %1476 = vmatmul.msk.bf16.gmra.mxu1 %vm152_vm1, %v337_v14 }
 0x192   :  { %1477 = vmatmul.msk.bf16.gmra.mxu1 %vm152_vm1, %v338_v18 }
 0x1a2   :  { %1478 = vmatmul.msk.bf16.gmra.mxu1 %vm152_vm1, %v339_v39 }
 0x1b2   :  { %1479 = vmatmul.msk.bf16.gmra.mxu1 %vm152_vm1, %v340_v42 }
 0x1c2   :  { %1480 = vmatmul.msk.bf16.gmra.mxu1 %vm152_vm1, %v341_v48 }
 0x1d2   :  { %1481 = vmatmul.msk.bf16.gmra.mxu1 %vm152_vm1, %v342_v54 }
 0x1df   :  { %v400_v1 = vpop.f32.mrf.mxu1 }
 0x1e7   :  { %v402_v4 = vpop.f32.mrf.mxu1 }
 0x1e8   :  { %v440_v7 = vadd.f32 %v402_v4, %v400_v1 }
 0x1ef   :  { %v405_v33 = vpop.f32.mrf.mxu1 }
 0x1f0   :  { %v441_v57 = vadd.f32 %v440_v7, %v405_v33 }
 0x1f7   :  { %v407_v56 = vpop.f32.mrf.mxu1 }
 0x1f8   :  { %v442_v3 = vadd.f32 %v441_v57, %v407_v56 }
 0x1ff   :  { %v410_v34 = vpop.f32.mrf.mxu1 }
 0x200   :  { %v443_v37 = vadd.f32 %v442_v3, %v410_v34 }
 0x207   :  { %v412_v59 = vpop.f32.mrf.mxu1 }
 0x208   :  { %v444_v5 = vadd.f32 %v443_v37, %v412_v59  ;;  %v1532_v37 = vld [vmem:[%s2685_s3 + $0x60] sm:$0xf] }
 0x20f   :  { %v415_v60 = vpop.f32.mrf.mxu1 }
 0x210   :  { %v445_v6 = vadd.f32 %v444_v5, %v415_v60  ;;  %v1596_v5 = vld [vmem:[%s2685_s3 + $0x64] sm:$0xf] }
 0x217   :  { %v417_v35 = vpop.f32.mrf.mxu1 }
 0x218   :  { %v446_v8 = vadd.f32 %v445_v6, %v417_v35 }
 0x21f   :  { %v420_v62 = vpop.f32.mrf.mxu1 }
 0x220   :  { %v447_v23 = vadd.f32 %v446_v8, %v420_v62 }
 0x227   :  { %v422_v0 = vpop.f32.mrf.mxu1 }
 0x228   :  { %v448_v24 = vadd.f32 %v447_v23, %v422_v0 }
 0x22f   :  { %v425_v11 = vpop.f32.mrf.mxu1 }
 0x230   :  { %v449_v10 = vadd.f32 %v448_v24, %v425_v11 }
 0x237   :  { %v427_v36 = vpop.f32.mrf.mxu1 }
 0x238   :  { %v450_v12 = vadd.f32 %v449_v10, %v427_v36 }
 0x23f   :  { %v430_v2 = vpop.f32.mrf.mxu1 }
 0x240   :  { %v451_v13 = vadd.f32 %v450_v12, %v430_v2 }
 0x247   :  { %v2089_v44 = vpop.f32.mrf.mxu1 }
 0x248   :  { %v452_v14 = vadd.f32 %v451_v13, %v2089_v44 }
 0x24f   :  { %v2091_v53 = vpop.f32.mrf.mxu1 }
 0x250   :  { %v453_v25 = vadd.f32 %v452_v14, %v2091_v53 }
 0x257   :  { %v2095_v38 = vpop.f32.mrf.mxu1 }
 0x258   :  { %v454_v63 = vadd.f32 %v453_v25, %v2095_v38  ;;  %v1524_v25 = vld [vmem:[%s2685_s3 + $0x50] sm:$0xf] }
 0x25a   :  { %v455_v15 = vrot.slane %v454_v63, 4 }
 0x25c   :  { %v456_v16 = vadd.f32 %v455_v15, %v454_v63  ;;  %v1594_v63 = vld [vmem:[%s2685_s3 + $0x54] sm:$0xf] }
 0x25e   :  { %v457_v17 = vrot.slane %v456_v16, 2 }
 0x260   :  { %v458_v18 = vadd.f32 %v457_v17, %v456_v16 }
 0x262   :  { %v459_v41 = vrot.slane %v458_v18, 1 }
 0x264   :  { %v460_v27 = vadd.f32 %v459_v41, %v458_v18 }
 0x266   :  { %v461_v9 = vmul.f32 %v460_v27, %v1953_v20 }
 0x268   :  { %v2099_v19 = vsub.f32 %v400_v1, %v461_v9  ;;  %v2101_v21 = vsub.f32 %v402_v4, %v461_v9  ;;  %v2103_v22 = vsub.f32 %v405_v33, %v461_v9  ;;  %v2109_v31 = vsub.f32 %v407_v56, %v461_v9  ;;  %v1540_v33 = vld [vmem:[%s2685_s3 + $0x70] sm:$0xf]  ;;  %v1599_v56 = vld [vmem:[%s2685_s3 + $0x74] sm:$0xf0] }
 0x269   :  { %v2111_v40 = vsub.f32 %v410_v34, %v461_v9  ;;  %v2115_v29 = vsub.f32 %v412_v59, %v461_v9  ;;  %v2119_v55 = vsub.f32 %v415_v60, %v461_v9  ;;  %v2123_v46 = vsub.f32 %v417_v35, %v461_v9  ;;  %v1598_v34 = vld [vmem:[%s2685_s3 + $0x74] sm:$0xf]  ;;  %v1542_v60 = vld [vmem:[%s2685_s3 + $0x78] sm:$0xf0] }
 0x26a   :  { %v478_v39 = vmul.f32 %v2099_v19, %v2099_v19  ;;  %v479_v45 = vmul.f32 %v2101_v21, %v2101_v21  ;;  %v480_v26 = vmul.f32 %v2103_v22, %v2103_v22  ;;  %v481_v42 = vmul.f32 %v2109_v31, %v2109_v31 }
 0x26b   :  { %v482_v43 = vmul.f32 %v2111_v40, %v2111_v40  ;;  %v483_v47 = vmul.f32 %v2115_v29, %v2115_v29  ;;  %v2127_v58 = vsub.f32 %v420_v62, %v461_v9  ;;  %v484_v61 = vmul.f32 %v2119_v55, %v2119_v55 }
 0x26c   :  { %v494_v28 = vadd.f32 %v479_v45, %v478_v39  ;;  %v2131_v50 = vsub.f32 %v422_v0, %v461_v9  ;;  %v485_v32 = vmul.f32 %v2123_v46, %v2123_v46  ;;  %v2135_v54 = vsub.f32 %v425_v11, %v461_v9  ;;  %v1516_v45 = vld [vmem:[%s2685_s3 + $0x40] sm:$0xf] }
 0x26d   :  { %v486_v1 = vmul.f32 %v2127_v58, %v2127_v58  ;;  %v1541_v59 = vor.u32 %v1599_v56, %v1540_v33  ;;  %v2151_v35 = vsub.f32 %v427_v36, %v461_v9  ;;  %v1545_v11 = vor.u32 %v1598_v34, %v1542_v60  ;;  %v1597_v36 = vld [vmem:[%s2685_s3 + $0x64] sm:$0xf0]  ;;  %v1500_v33 = vld [vmem:[%s2685_s3 + $0x20] sm:$0xf]  ;;  %v1588_v34 = vld [vmem:[%s2685_s3 + $0x24] sm:$0xf] }
 0x26e   :  { %v495_v51 = vadd.f32 %v494_v28, %v480_v26  ;;  %v487_v62 = vmul.f32 %v2131_v50, %v2131_v50  ;;  %v2155_v7 = vsub.f32 %v430_v2, %v461_v9  ;;  %v488_v57 = vmul.f32 %v2135_v54, %v2135_v54  ;;  %v1534_v2 = vld [vmem:[%s2685_s3 + $0x68] sm:$0xf0]  ;;  %v1589_v56 = vld [vmem:[%s2685_s3 + $0x24] sm:$0xf0] }
 0x26f   :  { %685 = vmatpush.bf16.msra.mxu2 %v1541_v59  ;;  %734 = vmatpush.bf16.msra.mxu3 %v1545_v11  ;;  %v1533_v6 = vor.u32 %v1597_v36, %v1532_v37  ;;  %v2172_v8 = vsub.f32 %v2089_v44, %v461_v9  ;;  %v489_v23 = vmul.f32 %v2151_v35, %v2151_v35  ;;  %v1595_v44 = vld [vmem:[%s2685_s3 + $0x54] sm:$0xf0]  ;;  %v1518_v28 = vld [vmem:[%s2685_s3 + $0x48] sm:$0xf0]  ;;  %v1492_v11 = vld [vmem:[%s2685_s3 + $0x10] sm:$0xf] }
 0x270   :  { %v496_v30 = vadd.f32 %v495_v51, %v481_v42  ;;  %v1537_v10 = vor.u32 %v1596_v5, %v1534_v2  ;;  %v2177_v12 = vsub.f32 %v2091_v53, %v461_v9  ;;  %v490_v13 = vmul.f32 %v2155_v7, %v2155_v7  ;;  %v1526_v53 = vld [vmem:[%s2685_s3 + $0x58] sm:$0xf0]  ;;  %v1502_v60 = vld [vmem:[%s2685_s3 + $0x28] sm:$0xf0]  ;;  %v1586_v37 = vld [vmem:[%s2685_s3 + $0x14] sm:$0xf] }
 0x271   :  { %v1525_v15 = vor.u32 %v1595_v44, %v1524_v25  ;;  %v2194_v16 = vsub.f32 %v2095_v38, %v461_v9  ;;  %v491_v17 = vmul.f32 %v2172_v8, %v2172_v8  ;;  %v1529_v41 = vor.u32 %v1594_v63, %v1526_v53  ;;  %v1593_v38 = vld [vmem:[%s2685_s3 + $0x44] sm:$0xf0]  ;;  %v1592_v9 = vld [vmem:[%s2685_s3 + $0x44] sm:$0xf]  ;;  %v1494_v36 = vld [vmem:[%s2685_s3 + $0x18] sm:$0xf0] }
 0x272   :  { %v497_v48 = vadd.f32 %v496_v30, %v482_v43  ;;  %v492_v27 = vmul.f32 %v2177_v12, %v2177_v12  ;;  %v1517_v26 = vor.u32 %v1593_v38, %v1516_v45  ;;  %v1521_v43 = vor.u32 %v1592_v9, %v1518_v28  ;;  %v1484_v2 = vld [vmem:[%s2685_s3] sm:$0xf] }
 0x273   :  { %686 = vmatpush.bf16.msra.mxu2 %v1533_v6  ;;  %735 = vmatpush.bf16.msra.mxu3 %v1537_v10  ;;  %v493_v42 = vmul.f32 %v2194_v16, %v2194_v16  ;;  %v1501_v59 = vor.u32 %v1589_v56, %v1500_v33  ;;  %v1497_v6 = vor.u32 %v1586_v37, %v1494_v36  ;;  %v1486_v10 = vld [vmem:[%s2685_s3 + $0x8] sm:$0xf0] }
 0x274   :  { %v498_v49 = vadd.f32 %v497_v48, %v483_v47  ;;  %v1508_v47 = vld [vmem:[%s2685_s3 + $0x30] sm:$0xf]  ;;  %v1591_v48 = vld [vmem:[%s2685_s3 + $0x34] sm:$0xf0] }
 0x276   :  { %v499_v52 = vadd.f32 %v498_v49, %v484_v61  ;;  %v1590_v61 = vld [vmem:[%s2685_s3 + $0x34] sm:$0xf]  ;;  %v1509_v49 = vor.u32 %v1591_v48, %v1508_v47 }
 0x277   :  { %687 = vmatpush.bf16.msra.mxu2 %v1525_v15  ;;  %736 = vmatpush.bf16.msra.mxu3 %v1529_v41 }
 0x278   :  { %v500_v4 = vadd.f32 %v499_v52, %v485_v32  ;;  %v1510_v32 = vld [vmem:[%s2685_s3 + $0x38] sm:$0xf0] }
 0x27a   :  { %v501_v0 = vadd.f32 %v500_v4, %v486_v1  ;;  %v1513_v1 = vor.u32 %v1590_v61, %v1510_v32 }
 0x27b   :  { %688 = vmatpush.bf16.msra.mxu2 %v1517_v26  ;;  %737 = vmatpush.bf16.msra.mxu3 %v1521_v43 }
 0x27c   :  { %v502_v3 = vadd.f32 %v501_v0, %v487_v62  ;;  %v1505_v0 = vor.u32 %v1588_v34, %v1502_v60 }
 0x27e   :  { %v503_v24 = vadd.f32 %v502_v3, %v488_v57  ;;  %v1587_v57 = vld [vmem:[%s2685_s3 + $0x14] sm:$0xf0] }
 0x27f   :  { %689 = vmatpush.bf16.msra.mxu2 %v1509_v49  ;;  %738 = vmatpush.bf16.msra.mxu3 %v1513_v1  ;;  %v1493_v3 = vor.u32 %v1587_v57, %v1492_v11 }
 0x280   :  { %v504_v14 = vadd.f32 %v503_v24, %v489_v23  ;;  %v1585_v23 = vld [vmem:[%s2685_s3 + $0x4] sm:$0xf0]  ;;  %v1584_v24 = vld [vmem:[%s2685_s3 + $0x4] sm:$0xf] }
 0x281   :  { %v1489_v44 = vor.u32 %v1584_v24, %v1486_v10 }
 0x282   :  { %v505_v18 = vadd.f32 %v504_v14, %v490_v13  ;;  %v1485_v14 = vor.u32 %v1585_v23, %v1484_v2 }
 0x283   :  { %690 = vmatpush.bf16.msra.mxu2 %v1501_v59  ;;  %739 = vmatpush.bf16.msra.mxu3 %v1505_v0 }
 0x284   :  { %v506_v39 = vadd.f32 %v505_v18, %v491_v17 }
 0x286   :  { %v507_v51 = vadd.f32 %v506_v39, %v492_v27 }
 0x287   :  { %691 = vmatpush.bf16.msra.mxu2 %v1493_v3  ;;  %740 = vmatpush.bf16.msra.mxu3 %v1497_v6 }
 0x288   :  { %v508_v30 = vadd.f32 %v507_v51, %v493_v42 }
 0x28a   :  { %v509_v52 = vrot.slane %v508_v30, 4 }
 0x28b   :  { %692 = vmatpush.bf16.msra.mxu2 %v1485_v14  ;;  %741 = vmatpush.bf16.msra.mxu3 %v1489_v44 }
 0x28c   :  { %v510_v4 = vadd.f32 %v509_v52, %v508_v30 }
 0x28e   :  { %v511_v62 = vrot.slane %v510_v4, 2 }
 0x290   :  { %v512_v5 = vadd.f32 %v511_v62, %v510_v4 }
 0x292   :  { %v513_v13 = vrot.slane %v512_v5, 1 }
 0x294   :  { %v514_v25 = vadd.f32 %v513_v13, %v512_v5 }
 0x296   :  { %v515_v63 = vmul.f32 %v514_v25, %v1953_v20 }
 0x298   :  { %v516_v15 = vadd.f32 1e-05, %v515_v63 }
 0x29a   :  { %1611 = vrsqrt.f32 %v516_v15  ;;  %vm523_vm7 = vweird.f32 %v516_v15 }
 0x2a0   :  { %v1612_v53 = vpop.eup %1611 }
 0x2a1   :  { %v518_v17 = vmul.f32 %v1612_v53, %v516_v15  ;;  %vm524_vm6 = vweird.f32 %v1612_v53 }
 0x2a2   :  { %vm525_vm8 = vmor %vm523_vm7, %vm524_vm6 }
 0x2a3   :  { %v519_v18 = vmul.f32 %v1612_v53, %v518_v17 }
 0x2a5   :  { %v520_v41 = vmul.f32 0.5, %v519_v18 }
 0x2a7   :  { %v521_v27 = vsub.f32 1.5, %v520_v41 }
 0x2a9   :  { %v522_v39 = vmul.f32 %v1612_v53, %v521_v27 }
 0x2ab   :  { %v2263_v45 = vsel %vm525_vm8, %v1612_v53, %v522_v39 }
 0x2ac   :  { %v527_v38 = vmul.f32 %v2263_v45, %v2099_v19  ;;  %v528_v20 = vmul.f32 %v2263_v45, %v2101_v21  ;;  %v529_v43 = vmul.f32 %v2263_v45, %v2103_v22  ;;  %v530_v30 = vmul.f32 %v2263_v45, %v2109_v31 }
 0x2ad   :  { %v531_v21 = vmul.f32 %v2263_v45, %v2111_v40  ;;  %v532_v32 = vmul.f32 %v2263_v45, %v2115_v29  ;;  %v533_v31 = vmul.f32 %v2263_v45, %v2119_v55  ;;  %v534_v56 = vmul.f32 %v2263_v45, %v2123_v46 }
 0x2ae   :  { %v543_v9 = vmul.f32 0.2, %v527_v38  ;;  %v544_v26 = vmul.f32 0.2, %v528_v20  ;;  %v545_v47 = vmul.f32 0.2, %v529_v43  ;;  %v535_v29 = vmul.f32 %v2263_v45, %v2127_v58 }
 0x2af   :  { %v546_v48 = vmul.f32 0.2, %v530_v30  ;;  %v547_v52 = vmul.f32 0.2, %v531_v21  ;;  %v548_v1 = vmul.f32 0.2, %v532_v32  ;;  %v536_v0 = vmul.f32 %v2263_v45, %v2131_v50 }
 0x2b0   :  { %v559_v28 = vmax.f32 %v527_v38, %v543_v9  ;;  %v560_v42 = vmax.f32 %v528_v20, %v544_v26  ;;  %v561_v61 = vmax.f32 %v529_v43, %v545_v47  ;;  %v549_v34 = vmul.f32 0.2, %v533_v31 }
 0x2b1   :  { %v562_v19 = vmax.f32 %v530_v30, %v546_v48  ;;  %v563_v4 = vmax.f32 %v531_v21, %v547_v52  ;;  %v564_v22 = vmax.f32 %v532_v32, %v548_v1  ;;  %v550_v59 = vmul.f32 0.2, %v534_v56 }
 0x2b2   :  { %v591_v51 = vpack.c.bf16 %v560_v42, %v559_v28  ;;  %v565_v60 = vmax.f32 %v533_v31, %v549_v34  ;;  %v551_v11 = vmul.f32 0.2, %v535_v29  ;;  %v552_v57 = vmul.f32 0.2, %v536_v0 }
 0x2b3   :  { %v592_v49 = vpack.c.bf16 %v562_v19, %v561_v61  ;;  %v593_v33 = vpack.c.bf16 %v564_v22, %v563_v4  ;;  %v566_v40 = vmax.f32 %v534_v56, %v550_v59  ;;  %v537_v46 = vmul.f32 %v2263_v45, %v2135_v54 }
 0x2b4   :  { %693 = vmatmul.bf16.vlgmr.msra.gmra.mxu2 %v591_v51  ;;  %742 = vmatmul.bf16.vlgmr.msra.gmra.mxu3 %v591_v51  ;;  %v567_v3 = vmax.f32 %v535_v29, %v551_v11  ;;  %v568_v55 = vmax.f32 %v536_v0, %v552_v57  ;;  %v538_v36 = vmul.f32 %v2263_v45, %v2151_v35 }
 0x2b5   :  { %v594_v62 = vpack.c.bf16 %v566_v40, %v565_v60  ;;  %v553_v5 = vmul.f32 0.2, %v537_v46  ;;  %v539_v50 = vmul.f32 %v2263_v45, %v2155_v7  ;;  %v540_v24 = vmul.f32 %v2263_v45, %v2172_v8  ;;  %v599_v8 = vld [vmem:[%s2686_s4] sm:$0x3]  ;;  %s1797_s4 = smov [#allocation5]  }
 0x2b6   :  { %v595_v37 = vpack.c.bf16 %v568_v55, %v567_v3  ;;  %v554_v6 = vmul.f32 0.2, %v538_v36  ;;  %v542_v35 = vmul.f32 %v2263_v45, %v2194_v16  ;;  %v541_v44 = vmul.f32 %v2263_v45, %v2177_v12  ;;  %s1427_s20 = sshll.u32 %s1797_s4, 4  ;;  %s1428_s20 = int_to_ptr.vmem [resolvable:$true] %s1427_s20 }
 0x2b7   :  { %v569_v2 = vmax.f32 %v537_v46, %v553_v5  ;;  %v555_v10 = vmul.f32 0.2, %v539_v50  ;;  %v556_v13 = vmul.f32 0.2, %v540_v24  ;;  %v2300_v18 = vperm.slane %v599_v8, 0 }
 0x2b8   :  { %v570_v58 = vmax.f32 %v538_v36, %v554_v6  ;;  %v558_v63 = vmul.f32 0.2, %v542_v35  ;;  %v557_v15 = vmul.f32 0.2, %v541_v44  ;;  %v2302_v41 = vperm.slane %v599_v8, 1 }
 0x2b9   :  { %v571_v14 = vmax.f32 %v539_v50, %v555_v10  ;;  %v572_v54 = vmax.f32 %v540_v24, %v556_v13 }
 0x2ba   :  { %v596_v23 = vpack.c.bf16 %v570_v58, %v569_v2  ;;  %v573_v53 = vmax.f32 %v541_v44, %v557_v15  ;;  %v574_v7 = vmax.f32 %v542_v35, %v558_v63 }
 0x2bb   :  { %v597_v25 = vpack.c.bf16 %v572_v54, %v571_v14 }
 0x2bc   :  { %v598_v17 = vpack.c.bf16 %v574_v7, %v573_v53 }
 0x2c4   :  { %698 = vmatmul.bf16.gmra.mxu2 %v592_v49  ;;  %747 = vmatmul.bf16.gmra.mxu3 %v592_v49 }
 0x2d4   :  { %703 = vmatmul.bf16.gmra.mxu2 %v593_v33  ;;  %752 = vmatmul.bf16.gmra.mxu3 %v593_v33 }
 0x2e4   :  { %708 = vmatmul.bf16.gmra.mxu2 %v594_v62  ;;  %757 = vmatmul.bf16.gmra.mxu3 %v594_v62 }
 0x2f4   :  { %713 = vmatmul.bf16.gmra.mxu2 %v595_v37  ;;  %762 = vmatmul.bf16.gmra.mxu3 %v595_v37 }
 0x304   :  { %718 = vmatmul.bf16.gmra.mxu2 %v596_v23  ;;  %767 = vmatmul.bf16.gmra.mxu3 %v596_v23 }
 0x314   :  { %723 = vmatmul.bf16.gmra.mxu2 %v597_v25  ;;  %772 = vmatmul.bf16.gmra.mxu3 %v597_v25 }
 0x324   :  { %728 = vmatmul.bf16.gmra.mxu2 %v598_v17  ;;  %777 = vmatmul.bf16.gmra.mxu3 %v598_v17 }
 0x337   :  { %v694_v27 = vpop.f32.mrf.mxu2  ;;  %v743_v16 = vpop.f32.mrf.mxu3 }
 0x338   :  { %v695_v39 = vadd.f32 %v694_v27, %v2300_v18  ;;  %v744_v12 = vadd.f32 %v743_v16, %v2302_v41 }
 0x33a   :  { %v1546_v45 = vmul.f32 -1.442695, %v695_v39  ;;  %v1547_v38 = vmul.f32 -1.442695, %v744_v12 }
 0x33c   :  { %1613 = vpow2.f32 %v1546_v45 }
 0x33d   :  { %1615 = vpow2.f32 %v1547_v38 }
 0x33f   :  { %v696_v20 = vpop.f32.mrf.mxu2  ;;  %v745_v9 = vpop.f32.mrf.mxu3 }
 0x340   :  { %v697_v26 = vadd.f32 %v696_v20, %v2300_v18  ;;  %v746_v28 = vadd.f32 %v745_v9, %v2302_v41 }
 0x342   :  { %v1614_v42 = vpop.eup %1613  ;;  %v1548_v51 = vmul.f32 -1.442695, %v697_v26  ;;  %v1549_v47 = vmul.f32 -1.442695, %v746_v28 }
 0x343   :  { %v1616_v43 = vpop.eup %1615  ;;  %v879_v30 = vadd.f32 1.0, %v1614_v42 }
 0x344   :  { %v880_v48 = vadd.f32 1.0, %v1616_v43  ;;  %1617 = vpow2.f32 %v1548_v51 }
 0x345   :  { %1619 = vrcp.f32 %v879_v30  ;;  %v920_v34 = vand.u32 2147483647, %v879_v30  ;;  %v922_v40 = vand.u32 2147483648, %v879_v30  ;;  %vm916_vm9 = vweird.f32 %v879_v30 }
 0x346   :  { %1621 = vrcp.f32 %v880_v48  ;;  %v935_v62 = vand.u32 2147483647, %v880_v48  ;;  %v937_v11 = vand.u32 2147483648, %v880_v48  ;;  %vm931_vm12 = vweird.f32 %v880_v48 }
 0x347   :  { %1623 = vpow2.f32 %v1549_v47  ;;  %v699_v61 = vpop.f32.mrf.mxu2  ;;  %v748_v19 = vpop.f32.mrf.mxu3  ;;  %vm2316_vm11 = vcmp.eq.f32.partialorder %v920_v34, 8.507059e+37  ;;  %v923_v6 = vor.u32 1.1754944e-38, %v922_v40 }
 0x348   :  { %v700_v49 = vadd.f32 %v699_v61, %v2300_v18  ;;  %v749_v21 = vadd.f32 %v748_v19, %v2302_v41  ;;  %vm2320_vm14 = vcmp.eq.f32.partialorder %v935_v62, 8.507059e+37  ;;  %v938_v24 = vor.u32 1.1754944e-38, %v937_v11 }
 0x34a   :  { %v1618_v32 = vpop.eup %1617  ;;  %v1550_v52 = vmul.f32 -1.442695, %v700_v49  ;;  %v1551_v22 = vmul.f32 -1.442695, %v749_v21 }
 0x34b   :  { %v1620_v1 = vpop.eup %1619  ;;  %v2310_v4 = vadd.f32 1.0, %v1618_v32 }
 0x34c   :  { %v1622_v33 = vpop.eup %1621  ;;  %v912_v31 = vmul.f32 %v1620_v1, %v879_v30  ;;  %1625 = vpow2.f32 %v1550_v52  ;;  %vm917_vm10 = vweird.f32 %v1620_v1 }
 0x34d   :  { %v1624_v56 = vpop.eup %1623  ;;  %v927_v59 = vmul.f32 %v1622_v33, %v880_v48  ;;  %1627 = vrcp.f32 %v2310_v4  ;;  %vm932_vm13 = vweird.f32 %v1622_v33  ;;  %vm918_vm15 = vmor %vm916_vm9, %vm917_vm10  ;;  %v950_v10 = vand.u32 2147483647, %v2310_v4 }
 0x34e   :  { %v913_v60 = vsub.f32 1.0, %v912_v31  ;;  %v2313_v29 = vadd.f32 1.0, %v1624_v56  ;;  %1629 = vpow2.f32 %v1551_v22  ;;  %vm933_vm0 = vmor %vm931_vm12, %vm932_vm13  ;;  %v952_v53 = vand.u32 2147483648, %v2310_v4 }
 0x34f   :  { %v928_v0 = vsub.f32 1.0, %v927_v59  ;;  %v701_v57 = vpop.f32.mrf.mxu2  ;;  %v750_v3 = vpop.f32.mrf.mxu3  ;;  %vm946_vm1 = vweird.f32 %v2310_v4  ;;  %vm2340_vm3 = vcmp.eq.f32.partialorder %v950_v10, 8.507059e+37 }
 0x350   :  { %v914_v55 = vmul.f32 %v1620_v1, %v913_v60  ;;  %1631 = vrcp.f32 %v2313_v29  ;;  %v702_v58 = vadd.f32 %v701_v57, %v2300_v18  ;;  %v751_v35 = vadd.f32 %v750_v3, %v2302_v41 }
 0x351   :  { %v929_v46 = vmul.f32 %v1622_v33, %v928_v0  ;;  %v953_v9 = vor.u32 1.1754944e-38, %v952_v53  ;;  %v967_v42 = vand.u32 2147483648, %v2313_v29  ;;  %v965_v47 = vand.u32 2147483647, %v2313_v29 }
 0x352   :  { %v1626_v36 = vpop.eup %1625  ;;  %v915_v5 = vadd.f32 %v1620_v1, %v914_v55  ;;  %v1552_v25 = vmul.f32 -1.442695, %v702_v58  ;;  %v1553_v38 = vmul.f32 -1.442695, %v751_v35  ;;  %vm961_vm6 = vweird.f32 %v2313_v29 }
 0x353   :  { %v1628_v23 = vpop.eup %1627  ;;  %v930_v50 = vadd.f32 %v1622_v33, %v929_v46  ;;  %v2326_v13 = vadd.f32 1.0, %v1626_v36  ;;  %v968_v22 = vor.u32 1.1754944e-38, %v967_v42  ;;  %vm966_vm8 = vcmp.eq.f32.partialorder %v965_v47, 8.507059e+37 }
 0x354   :  { %v919_v14 = vsel %vm918_vm15, %v1620_v1, %v915_v5  ;;  %v942_v54 = vmul.f32 %v1628_v23, %v2310_v4  ;;  %v1630_v44 = vpop.eup %1629  ;;  %vm947_vm2 = vweird.f32 %v1628_v23 }
 0x355   :  { %v924_v63 = vsel %vm2316_vm11, %v923_v6, %v919_v14  ;;  %v934_v15 = vsel %vm933_vm0, %v1622_v33, %v930_v50  ;;  %1633 = vrcp.f32 %v2326_v13  ;;  %v2337_v16 = vadd.f32 1.0, %v1630_v44  ;;  %vm948_vm4 = vmor %vm946_vm1, %vm947_vm2 }
 0x356   :  { %v1632_v7 = vpop.eup %1631  ;;  %1391 = vst [vmem:[#allocation5] sm:$0xff] %v924_v63  ;;  %v939_v17 = vsel %vm2320_vm14, %v938_v24, %v934_v15  ;;  %v943_v8 = vsub.f32 1.0, %v942_v54  ;;  %1635 = vpow2.f32 %v1552_v25  ;;  %v980_v49 = vand.u32 2147483647, %v2326_v13 }
 0x357   :  { %1392 = vst [vmem:[#allocation5 + $0x8] sm:$0xff] %v939_v17  ;;  %v957_v27 = vmul.f32 %v1632_v7, %v2313_v29  ;;  %v704_v39 = vpop.f32.mrf.mxu2  ;;  %v753_v12 = vpop.f32.mrf.mxu3  ;;  %1637 = vrcp.f32 %v2337_v16  ;;  %vm962_vm5 = vweird.f32 %v1632_v7  ;;  %v982_v1 = vand.u32 2147483648, %v2326_v13 }
 0x358   :  { %v944_v45 = vmul.f32 %v1628_v23, %v943_v8  ;;  %1639 = vpow2.f32 %v1553_v38  ;;  %v705_v51 = vadd.f32 %v704_v39, %v2300_v18  ;;  %v754_v48 = vadd.f32 %v753_v12, %v2302_v41  ;;  %vm963_vm7 = vmor %vm961_vm6, %vm962_vm5 }
 0x359   :  { %v958_v26 = vsub.f32 1.0, %v957_v27  ;;  %vm976_vm10 = vweird.f32 %v2326_v13  ;;  %vm2359_vm11 = vcmp.eq.f32.partialorder %v980_v49, 8.507059e+37  ;;  %v983_v3 = vor.u32 1.1754944e-38, %v982_v1 }
 0x35a   :  { %v945_v28 = vadd.f32 %v1628_v23, %v944_v45  ;;  %v1554_v4 = vmul.f32 -1.442695, %v705_v51  ;;  %v1555_v56 = vmul.f32 -1.442695, %v754_v48  ;;  %v995_v36 = vand.u32 2147483647, %v2337_v16 }
 0x35b   :  { %v1634_v43 = vpop.eup %1633  ;;  %v959_v30 = vmul.f32 %v1632_v7, %v958_v26  ;;  %v997_v5 = vand.u32 2147483648, %v2337_v16  ;;  %vm991_vm14 = vweird.f32 %v2337_v16 }
 0x35c   :  { %v949_v61 = vsel %vm948_vm4, %v1628_v23, %v945_v28  ;;  %v972_v19 = vmul.f32 %v1634_v43, %v2326_v13  ;;  %v1636_v21 = vpop.eup %1635  ;;  %1641 = vpow2.f32 %v1554_v4  ;;  %vm977_vm9 = vweird.f32 %v1634_v43 }
 0x35d   :  { %v954_v32 = vsel %vm2340_vm3, %v953_v9, %v949_v61  ;;  %v960_v52 = vadd.f32 %v1632_v7, %v959_v30  ;;  %v2355_v31 = vadd.f32 1.0, %v1636_v21  ;;  %v1638_v34 = vpop.eup %1637  ;;  %vm978_vm12 = vmor %vm976_vm10, %vm977_vm9  ;;  %vm996_vm0 = vcmp.eq.f32.partialorder %v995_v36, 8.507059e+37 }
 0x35e   :  { %1393 = vst [vmem:[#allocation5 + $0x10] sm:$0xff] %v954_v32  ;;  %v973_v33 = vsub.f32 1.0, %v972_v19  ;;  %v1640_v62 = vpop.eup %1639  ;;  %v987_v11 = vmul.f32 %v1638_v34, %v2337_v16  ;;  %vm992_vm13 = vweird.f32 %v1638_v34  ;;  %v998_v35 = vor.u32 1.1754944e-38, %v997_v5 }
 0x35f   :  { %v964_v59 = vsel %vm963_vm7, %v1632_v7, %v960_v52  ;;  %v706_v60 = vpop.f32.mrf.mxu2  ;;  %v755_v40 = vpop.f32.mrf.mxu3  ;;  %1643 = vrcp.f32 %v2355_v31  ;;  %v2364_v46 = vadd.f32 1.0, %v1640_v62  ;;  %vm993_vm15 = vmor %vm991_vm14, %vm992_vm13  ;;  %v1010_v44 = vand.u32 2147483647, %v2355_v31 }
 0x360   :  { %v969_v29 = vsel %vm966_vm8, %v968_v22, %v964_v59  ;;  %v974_v0 = vmul.f32 %v1634_v43, %v973_v33  ;;  %v988_v37 = vsub.f32 1.0, %v987_v11  ;;  %1645 = vpow2.f32 %v1555_v56 }
 0x361   :  { %1394 = vst [vmem:[#allocation5 + $0x18] sm:$0xff] %v969_v29  ;;  %v707_v6 = vadd.f32 %v706_v60, %v2300_v18  ;;  %v756_v2 = vadd.f32 %v755_v40, %v2302_v41  ;;  %1647 = vrcp.f32 %v2364_v46  ;;  %v1012_v8 = vand.u32 2147483648, %v2355_v31 }
 0x362   :  { %v975_v55 = vadd.f32 %v1634_v43, %v974_v0  ;;  %v989_v23 = vmul.f32 %v1638_v34, %v988_v37  ;;  %v1642_v50 = vpop.eup %1641  ;;  %v1025_v16 = vand.u32 2147483647, %v2364_v46  ;;  %v1027_v39 = vand.u32 2147483648, %v2364_v46 }
 0x363   :  { %v1556_v10 = vmul.f32 -1.442695, %v707_v6  ;;  %v2374_v14 = vadd.f32 1.0, %v1642_v50  ;;  %v1557_v54 = vmul.f32 -1.442695, %v756_v2  ;;  %vm1006_vm1 = vweird.f32 %v2355_v31 }
 0x364   :  { %v979_v58 = vsel %vm978_vm12, %v1634_v43, %v975_v55  ;;  %v990_v13 = vadd.f32 %v1638_v34, %v989_v23  ;;  %vm2386_vm2 = vcmp.eq.f32.partialorder %v1010_v44, 8.507059e+37  ;;  %v1013_v42 = vor.u32 1.1754944e-38, %v1012_v8 }
 0x365   :  { %v984_v24 = vsel %vm2359_vm11, %v983_v3, %v979_v58  ;;  %v1644_v25 = vpop.eup %1643  ;;  %1649 = vpow2.f32 %v1556_v10  ;;  %vm1021_vm4 = vweird.f32 %v2364_v46  ;;  %vm2393_vm5 = vcmp.eq.f32.partialorder %v1025_v16, 8.507059e+37 }
 0x366   :  { %1395 = vst [vmem:[#allocation5 + $0x20] sm:$0xff] %v984_v24  ;;  %v1646_v53 = vpop.eup %1645  ;;  %v994_v7 = vsel %vm993_vm15, %v1638_v34, %v990_v13  ;;  %v1002_v17 = vmul.f32 %v1644_v25, %v2355_v31  ;;  %1651 = vrcp.f32 %v2374_v14  ;;  %vm1007_vm3 = vweird.f32 %v1644_v25 }
 0x367   :  { %v709_v63 = vpop.f32.mrf.mxu2  ;;  %v758_v15 = vpop.f32.mrf.mxu3  ;;  %v999_v27 = vsel %vm996_vm0, %v998_v35, %v994_v7  ;;  %v2382_v38 = vadd.f32 1.0, %v1646_v53  ;;  %1653 = vpow2.f32 %v1557_v54  ;;  %v1028_v47 = vor.u32 1.1754944e-38, %v1027_v39  ;;  %vm1008_vm6 = vmor %vm1006_vm1, %vm1007_vm3 }
 0x368   :  { %v1648_v12 = vpop.eup %1647  ;;  %1396 = vst [vmem:[#allocation5 + $0x28] sm:$0xff] %v999_v27  ;;  %v1003_v45 = vsub.f32 1.0, %v1002_v17  ;;  %v710_v20 = vadd.f32 %v709_v63, %v2300_v18  ;;  %v759_v21 = vadd.f32 %v758_v15, %v2302_v41  ;;  %vm1036_vm8 = vweird.f32 %v2374_v14 }
 0x369   :  { %v1017_v26 = vmul.f32 %v1648_v12, %v2364_v46  ;;  %1655 = vrcp.f32 %v2382_v38  ;;  %vm1022_vm7 = vweird.f32 %v1648_v12  ;;  %v1040_v56 = vand.u32 2147483647, %v2374_v14 }
 0x36a   :  { %v1004_v28 = vmul.f32 %v1644_v25, %v1003_v45  ;;  %v1558_v49 = vmul.f32 -1.442695, %v710_v20  ;;  %v1042_v34 = vand.u32 2147483648, %v2374_v14  ;;  %v1055_v40 = vand.u32 2147483647, %v2382_v38  ;;  %vm1023_vm9 = vmor %vm1021_vm4, %vm1022_vm7 }
 0x36b   :  { %v1650_v51 = vpop.eup %1649  ;;  %v1018_v43 = vsub.f32 1.0, %v1017_v26  ;;  %v1057_v29 = vand.u32 2147483648, %v2382_v38  ;;  %v1559_v11 = vmul.f32 -1.442695, %v759_v21  ;;  %vm2419_vm11 = vcmp.eq.f32.partialorder %v1040_v56, 8.507059e+37 }
 0x36c   :  { %v1652_v48 = vpop.eup %1651  ;;  %v1005_v61 = vadd.f32 %v1644_v25, %v1004_v28  ;;  %v2397_v19 = vadd.f32 1.0, %v1650_v51  ;;  %v1043_v46 = vor.u32 1.1754944e-38, %v1042_v34  ;;  %vm1051_vm12 = vweird.f32 %v2382_v38 }
 0x36d   :  { %v1019_v32 = vmul.f32 %v1648_v12, %v1018_v43  ;;  %v1032_v52 = vmul.f32 %v1652_v48, %v2374_v14  ;;  %v1654_v22 = vpop.eup %1653  ;;  %vm1037_vm10 = vweird.f32 %v1652_v48  ;;  %vm2425_vm13 = vcmp.eq.f32.partialorder %v1055_v40, 8.507059e+37 }
 0x36e   :  { %v1009_v33 = vsel %vm1008_vm6, %v1644_v25, %v1005_v61  ;;  %1657 = vrcp.f32 %v2397_v19  ;;  %v2414_v0 = vadd.f32 1.0, %v1654_v22  ;;  %vm1038_vm14 = vmor %vm1036_vm8, %vm1037_vm10  ;;  %v1058_v23 = vor.u32 1.1754944e-38, %v1057_v29 }
 0x36f   :  { %v711_v1 = vpop.f32.mrf.mxu2  ;;  %v760_v4 = vpop.f32.mrf.mxu3  ;;  %v1014_v31 = vsel %vm2386_vm2, %v1013_v42, %v1009_v33  ;;  %v1020_v59 = vadd.f32 %v1648_v12, %v1019_v32  ;;  %v1033_v60 = vsub.f32 1.0, %v1032_v52  ;;  %1659 = vpow2.f32 %v1558_v49 }
 0x370   :  { %v1656_v62 = vpop.eup %1655  ;;  %1397 = vst [vmem:[#allocation5 + $0x30] sm:$0xff] %v1014_v31  ;;  %1661 = vrcp.f32 %v2414_v0  ;;  %v712_v50 = vadd.f32 %v711_v1, %v2300_v18  ;;  %v761_v24 = vadd.f32 %v760_v4, %v2302_v41  ;;  %v1070_v14 = vand.u32 2147483647, %v2397_v19 }
 0x371   :  { %v1024_v57 = vsel %vm1023_vm9, %v1648_v12, %v1020_v59  ;;  %v1034_v3 = vmul.f32 %v1652_v48, %v1033_v60  ;;  %v1047_v55 = vmul.f32 %v1656_v62, %v2382_v38  ;;  %1663 = vpow2.f32 %v1559_v11 }
 0x372   :  { %v1029_v37 = vsel %vm2393_vm5, %v1028_v47, %v1024_v57  ;;  %vm1052_vm15 = vweird.f32 %v1656_v62  ;;  %v1072_v15 = vand.u32 2147483648, %v2397_v19  ;;  %v1560_v53 = vmul.f32 -1.442695, %v712_v50 }
 0x373   :  { %1398 = vst [vmem:[#allocation5 + $0x38] sm:$0xff] %v1029_v37  ;;  %v1035_v5 = vadd.f32 %v1652_v48, %v1034_v3  ;;  %v1048_v6 = vsub.f32 1.0, %v1047_v55  ;;  %vm1066_vm0 = vweird.f32 %v2397_v19  ;;  %vm1053_vm1 = vmor %vm1051_vm12, %vm1052_vm15  ;;  %v1561_v16 = vmul.f32 -1.442695, %v761_v24 }
 0x374   :  { %v1658_v58 = vpop.eup %1657  ;;  %1665 = vpow2.f32 %v1560_v53  ;;  %vm2449_vm3 = vcmp.eq.f32.partialorder %v1070_v14, 8.507059e+37  ;;  %v1073_v38 = vor.u32 1.1754944e-38, %v1072_v15  ;;  %v1085_v30 = vand.u32 2147483647, %v2414_v0 }
 0x375   :  { %v1039_v10 = vsel %vm1038_vm14, %v1652_v48, %v1035_v5  ;;  %v1049_v13 = vmul.f32 %v1656_v62, %v1048_v6  ;;  %v1062_v54 = vmul.f32 %v1658_v58, %v2397_v19  ;;  %v1660_v44 = vpop.eup %1659  ;;  %vm1067_vm2 = vweird.f32 %v1658_v58 }
 0x376   :  { %v1044_v63 = vsel %vm2419_vm11, %v1043_v46, %v1039_v10  ;;  %v2439_v8 = vadd.f32 1.0, %v1660_v44  ;;  %v1662_v27 = vpop.eup %1661  ;;  %vm1068_vm4 = vmor %vm1066_vm0, %vm1067_vm2  ;;  %v1087_v48 = vand.u32 2147483648, %v2414_v0  ;;  %vm1081_vm6 = vweird.f32 %v2414_v0 }
 0x377   :  { %v714_v25 = vpop.f32.mrf.mxu2  ;;  %v763_v35 = vpop.f32.mrf.mxu3  ;;  %1399 = vst [vmem:[#allocation5 + $0x40] sm:$0xff] %v1044_v63  ;;  %v1050_v7 = vadd.f32 %v1656_v62, %v1049_v13  ;;  %v1063_v17 = vsub.f32 1.0, %v1062_v54  ;;  %v1077_v9 = vmul.f32 %v1662_v27, %v2414_v0  ;;  %vm1082_vm5 = vweird.f32 %v1662_v27 }
 0x378   :  { %v715_v39 = vadd.f32 %v714_v25, %v2300_v18  ;;  %v764_v12 = vadd.f32 %v763_v35, %v2302_v41  ;;  %v1664_v26 = vpop.eup %1663  ;;  %1667 = vrcp.f32 %v2439_v8  ;;  %v1100_v19 = vand.u32 2147483647, %v2439_v8  ;;  %vm1083_vm7 = vmor %vm1081_vm6, %vm1082_vm5 }
 0x379   :  { %v1054_v45 = vsel %vm1053_vm1, %v1656_v62, %v1050_v7  ;;  %v1064_v20 = vmul.f32 %v1658_v58, %v1063_v17  ;;  %v1078_v43 = vsub.f32 1.0, %v1077_v9  ;;  %v2455_v47 = vadd.f32 1.0, %v1664_v26 }
 0x37a   :  { %v1059_v28 = vsel %vm2425_vm13, %v1058_v23, %v1054_v45  ;;  %1669 = vpow2.f32 %v1561_v16  ;;  %v1562_v61 = vmul.f32 -1.442695, %v715_v39  ;;  %v1563_v49 = vmul.f32 -1.442695, %v764_v12  ;;  %v1666_v4 = vpop.eup %1665 }
 0x37b   :  { %1400 = vst [vmem:[#allocation5 + $0x48] sm:$0xff] %v1059_v28  ;;  %v1065_v51 = vadd.f32 %v1658_v58, %v1064_v20  ;;  %v1079_v32 = vmul.f32 %v1662_v27, %v1078_v43  ;;  %1671 = vrcp.f32 %v2455_v47  ;;  %v2465_v56 = vadd.f32 1.0, %v1666_v4 }
 0x37c   :  { %1673 = vpow2.f32 %v1562_v61  ;;  %vm1086_vm8 = vcmp.eq.f32.partialorder %v1085_v30, 8.507059e+37  ;;  %v1088_v59 = vor.u32 1.1754944e-38, %v1087_v48  ;;  %v1102_v60 = vand.u32 2147483648, %v2439_v8 }
 0x37d   :  { %v1069_v21 = vsel %vm1068_vm4, %v1658_v58, %v1065_v51  ;;  %v1080_v33 = vadd.f32 %v1662_v27, %v1079_v32  ;;  %1675 = vpow2.f32 %v1563_v49  ;;  %v1115_v29 = vand.u32 2147483647, %v2455_v47 }
 0x37e   :  { %v1074_v22 = vsel %vm2449_vm3, %v1073_v38, %v1069_v21  ;;  %v1668_v31 = vpop.eup %1667  ;;  %1677 = vrcp.f32 %v2465_v56  ;;  %vm1096_vm9 = vweird.f32 %v2439_v8  ;;  %vm2473_vm10 = vcmp.eq.f32.partialorder %v1100_v19, 8.507059e+37 }
 0x37f   :  { %v716_v52 = vpop.f32.mrf.mxu2  ;;  %v765_v1 = vpop.f32.mrf.mxu3  ;;  %1401 = vst [vmem:[#allocation5 + $0x50] sm:$0xff] %v1074_v22  ;;  %v1084_v40 = vsel %vm1083_vm7, %v1662_v27, %v1080_v33  ;;  %v1092_v62 = vmul.f32 %v1668_v31, %v2439_v8  ;;  %v1103_v46 = vor.u32 1.1754944e-38, %v1102_v60  ;;  %vm1111_vm11 = vweird.f32 %v2455_v47 }
 0x380   :  { %v717_v34 = vadd.f32 %v716_v52, %v2300_v18  ;;  %v1670_v0 = vpop.eup %1669  ;;  %v1089_v11 = vsel %vm1086_vm8, %v1088_v59, %v1084_v40  ;;  %v1117_v6 = vand.u32 2147483648, %v2455_v47  ;;  %vm1097_vm12 = vweird.f32 %v1668_v31 }
 0x381   :  { %v1672_v57 = vpop.eup %1671  ;;  %1402 = vst [vmem:[#allocation5 + $0x58] sm:$0xff] %v1089_v11  ;;  %v1093_v3 = vsub.f32 1.0, %v1092_v62  ;;  %v2477_v37 = vadd.f32 1.0, %v1670_v0  ;;  %vm2482_vm13 = vcmp.eq.f32.partialorder %v1115_v29, 8.507059e+37  ;;  %v766_v25 = vadd.f32 %v765_v1, %v2302_v41  ;;  %vm1098_vm14 = vmor %vm1096_vm9, %vm1097_vm12 }
 0x382   :  { %v1564_v36 = vmul.f32 -1.442695, %v717_v34  ;;  %v1107_v5 = vmul.f32 %v1672_v57, %v2455_v47  ;;  %v1674_v2 = vpop.eup %1673  ;;  %v1130_v63 = vand.u32 2147483647, %v2465_v56  ;;  %v1132_v14 = vand.u32 2147483648, %v2465_v56 }
 0x383   :  { %v1094_v58 = vmul.f32 %v1668_v31, %v1093_v3  ;;  %1679 = vrcp.f32 %v2477_v37  ;;  %v1676_v10 = vpop.eup %1675  ;;  %v2487_v54 = vadd.f32 1.0, %v1674_v2  ;;  %vm1112_vm15 = vweird.f32 %v1672_v57 }
 0x384   :  { %v1108_v13 = vsub.f32 1.0, %v1107_v5  ;;  %1681 = vpow2.f32 %v1564_v36  ;;  %v1678_v35 = vpop.eup %1677  ;;  %v2492_v15 = vadd.f32 1.0, %v1676_v10  ;;  %v1118_v7 = vor.u32 1.1754944e-38, %v1117_v6  ;;  %vm1113_vm0 = vmor %vm1111_vm11, %vm1112_vm15 }
 0x385   :  { %v1095_v44 = vadd.f32 %v1668_v31, %v1094_v58  ;;  %v1122_v17 = vmul.f32 %v1678_v35, %v2465_v56  ;;  %v1145_v16 = vand.u32 2147483647, %v2477_v37  ;;  %v1147_v39 = vand.u32 2147483648, %v2477_v37 }
 0x386   :  { %v1109_v53 = vmul.f32 %v1672_v57, %v1108_v13  ;;  %1683 = vrcp.f32 %v2487_v54  ;;  %v1565_v9 = vmul.f32 -1.442695, %v766_v25  ;;  %vm1126_vm1 = vweird.f32 %v2465_v56 }
 0x387   :  { %v719_v50 = vpop.f32.mrf.mxu2  ;;  %v768_v24 = vpop.f32.mrf.mxu3  ;;  %v1099_v27 = vsel %vm1098_vm14, %v1668_v31, %v1095_v44  ;;  %v1123_v20 = vsub.f32 1.0, %v1122_v17  ;;  %vm2506_vm2 = vcmp.eq.f32.partialorder %v1130_v63, 8.507059e+37  ;;  %v1133_v28 = vor.u32 1.1754944e-38, %v1132_v14 }
 0x388   :  { %v1104_v12 = vsel %vm2473_vm10, %v1103_v46, %v1099_v27  ;;  %v1110_v45 = vadd.f32 %v1672_v57, %v1109_v53  ;;  %1685 = vrcp.f32 %v2492_v15  ;;  %vm1127_vm3 = vweird.f32 %v1678_v35 }
 0x389   :  { %v1680_v8 = vpop.eup %1679  ;;  %1403 = vst [vmem:[#allocation5 + $0x60] sm:$0xff] %v1104_v12  ;;  %v1124_v51 = vmul.f32 %v1678_v35, %v1123_v20  ;;  %vm1141_vm4 = vweird.f32 %v2477_v37  ;;  %vm2515_vm5 = vcmp.eq.f32.partialorder %v1145_v16, 8.507059e+37  ;;  %v1148_v48 = vor.u32 1.1754944e-38, %v1147_v39  ;;  %vm1128_vm6 = vmor %vm1126_vm1, %vm1127_vm3 }
 0x38a   :  { %v1682_v42 = vpop.eup %1681  ;;  %v1114_v38 = vsel %vm1113_vm0, %v1672_v57, %v1110_v45  ;;  %v1137_v43 = vmul.f32 %v1680_v8, %v2477_v37  ;;  %1687 = vpow2.f32 %v1565_v9  ;;  %vm1156_vm7 = vweird.f32 %v2487_v54 }
 0x38b   :  { %v1119_v30 = vsel %vm2482_vm13, %v1118_v7, %v1114_v38  ;;  %v1125_v21 = vadd.f32 %v1678_v35, %v1124_v51  ;;  %v2519_v52 = vadd.f32 1.0, %v1682_v42  ;;  %v1160_v4 = vand.u32 2147483647, %v2487_v54 }
 0x38c   :  { %1404 = vst [vmem:[#allocation5 + $0x68] sm:$0xff] %v1119_v30  ;;  %v1138_v32 = vsub.f32 1.0, %v1137_v43  ;;  %v1684_v1 = vpop.eup %1683  ;;  %v720_v22 = vadd.f32 %v719_v50, %v2300_v18  ;;  %v769_v19 = vadd.f32 %v768_v24, %v2302_v41  ;;  %vm1142_vm8 = vweird.f32 %v1680_v8 }
 0x38d   :  { %v1129_v33 = vsel %vm1128_vm6, %v1678_v35, %v1125_v21  ;;  %v1152_v31 = vmul.f32 %v1684_v1, %v2487_v54  ;;  %v1162_v56 = vand.u32 2147483648, %v2487_v54  ;;  %1689 = vrcp.f32 %v2519_v52  ;;  %vm1143_vm9 = vmor %vm1141_vm4, %vm1142_vm8 }
 0x38e   :  { %v1139_v34 = vmul.f32 %v1680_v8, %v1138_v32  ;;  %v1686_v59 = vpop.eup %1685  ;;  %v1134_v60 = vsel %vm2506_vm2, %v1133_v28, %v1129_v33  ;;  %v1175_v11 = vand.u32 2147483647, %v2492_v15  ;;  %vm1157_vm10 = vweird.f32 %v1684_v1 }
 0x38f   :  { %v721_v61 = vpop.f32.mrf.mxu2  ;;  %v770_v49 = vpop.f32.mrf.mxu3  ;;  %1405 = vst [vmem:[#allocation5 + $0x70] sm:$0xff] %v1134_v60  ;;  %v1153_v29 = vsub.f32 1.0, %v1152_v31  ;;  %v1167_v0 = vmul.f32 %v1686_v59, %v2492_v15  ;;  %v1177_v57 = vand.u32 2147483648, %v2492_v15  ;;  %v1566_v3 = vmul.f32 -1.442695, %v720_v22  ;;  %vm1158_vm12 = vmor %vm1156_vm7, %vm1157_vm10 }
 0x390   :  { %v722_v40 = vadd.f32 %v721_v61, %v2300_v18  ;;  %v1140_v62 = vadd.f32 %v1680_v8, %v1139_v34  ;;  %v1567_v55 = vmul.f32 -1.442695, %v769_v19  ;;  %v1688_v36 = vpop.eup %1687  ;;  %vm1172_vm11 = vweird.f32 %v1686_v59 }
 0x391   :  { %v1154_v5 = vmul.f32 %v1684_v1, %v1153_v29  ;;  %v1168_v6 = vsub.f32 1.0, %v1167_v0  ;;  %v2540_v58 = vadd.f32 1.0, %v1688_v36  ;;  %1691 = vpow2.f32 %v1566_v3 }
 0x392   :  { %v1144_v46 = vsel %vm1143_vm9, %v1680_v8, %v1140_v62  ;;  %v1568_v23 = vmul.f32 -1.442695, %v722_v40  ;;  %1693 = vpow2.f32 %v1567_v55  ;;  %v771_v10 = vadd.f32 %v770_v49, %v2302_v41 }
 0x393   :  { %v1149_v2 = vsel %vm2515_vm5, %v1148_v48, %v1144_v46  ;;  %v1155_v37 = vadd.f32 %v1684_v1, %v1154_v5  ;;  %v1169_v24 = vmul.f32 %v1686_v59, %v1168_v6  ;;  %v1690_v13 = vpop.eup %1689  ;;  %vm1161_vm13 = vcmp.eq.f32.partialorder %v1160_v4, 8.507059e+37 }
 0x394   :  { %1406 = vst [vmem:[#allocation5 + $0x78] sm:$0xff] %v1149_v2  ;;  %v1163_v25 = vor.u32 1.1754944e-38, %v1162_v56  ;;  %1695 = vrcp.f32 %v2540_v58  ;;  %vm1171_vm14 = vweird.f32 %v2492_v15  ;;  %v1182_v14 = vmul.f32 %v1690_v13, %v2519_v52 }
 0x395   :  { %v1159_v44 = vsel %vm1158_vm12, %v1684_v1, %v1155_v37  ;;  %v1170_v63 = vadd.f32 %v1686_v59, %v1169_v24  ;;  %vm1173_vm15 = vmor %vm1171_vm14, %vm1172_vm11  ;;  %vm1176_vm0 = vcmp.eq.f32.partialorder %v1175_v11, 8.507059e+37  ;;  %v1178_v7 = vor.u32 1.1754944e-38, %v1177_v57 }
 0x396   :  { %v1164_v53 = vsel %vm1161_vm13, %v1163_v25, %v1159_v44  ;;  %1697 = vpow2.f32 %v1568_v23  ;;  %v1183_v17 = vsub.f32 1.0, %v1182_v14  ;;  %v1569_v27 = vmul.f32 -1.442695, %v771_v10 }
 0x397   :  { %v724_v50 = vpop.f32.mrf.mxu2  ;;  %v773_v35 = vpop.f32.mrf.mxu3  ;;  %1407 = vst [vmem:[#allocation5 + $0x80] sm:$0xff] %v1164_v53  ;;  %v1174_v54 = vsel %vm1173_vm15, %v1686_v59, %v1170_v63  ;;  %v1190_v45 = vand.u32 2147483647, %v2519_v52  ;;  %v1192_v15 = vand.u32 2147483648, %v2519_v52  ;;  %vm1187_vm1 = vweird.f32 %v1690_v13 }
 0x398   :  { %v725_v16 = vadd.f32 %v724_v50, %v2300_v18  ;;  %v1692_v39 = vpop.eup %1691  ;;  %v1179_v12 = vsel %vm1176_vm0, %v1178_v7, %v1174_v54  ;;  %v774_v20 = vadd.f32 %v773_v35, %v2302_v41  ;;  %v1184_v8 = vmul.f32 %v1690_v13, %v1183_v17 }
 0x399   :  { %v1694_v9 = vpop.eup %1693  ;;  %1408 = vst [vmem:[#allocation5 + $0x88] sm:$0xff] %v1179_v12  ;;  %v2554_v26 = vadd.f32 1.0, %v1692_v39  ;;  %1699 = vpow2.f32 %v1569_v27  ;;  %vm1186_vm2 = vweird.f32 %v2519_v52  ;;  %v1193_v47 = vor.u32 1.1754944e-38, %v1192_v15 }
 0x39a   :  { %v1696_v28 = vpop.eup %1695  ;;  %v2557_v42 = vadd.f32 1.0, %v1694_v9  ;;  %v1185_v38 = vadd.f32 %v1690_v13, %v1184_v8  ;;  %v1570_v43 = vmul.f32 -1.442695, %v725_v16  ;;  %vm1188_vm3 = vmor %vm1186_vm2, %vm1187_vm1  ;;  %v1571_v48 = vmul.f32 -1.442695, %v774_v20 }
 0x39b   :  { %v1197_v51 = vmul.f32 %v1696_v28, %v2540_v58  ;;  %1701 = vrcp.f32 %v2554_v26  ;;  %vm1191_vm4 = vcmp.eq.f32.partialorder %v1190_v45, 8.507059e+37  ;;  %vm1201_vm5 = vweird.f32 %v2540_v58 }
 0x39c   :  { %v1698_v30 = vpop.eup %1697  ;;  %1703 = vrcp.f32 %v2557_v42  ;;  %v1189_v49 = vsel %vm1188_vm3, %v1690_v13, %v1185_v38  ;;  %v1205_v52 = vand.u32 2147483647, %v2540_v58  ;;  %v1207_v1 = vand.u32 2147483648, %v2540_v58 }
 0x39d   :  { %v1198_v21 = vsub.f32 1.0, %v1197_v51  ;;  %v1194_v32 = vsel %vm1191_vm4, %v1193_v47, %v1189_v49  ;;  %vm1202_vm6 = vweird.f32 %v1696_v28  ;;  %v2565_v33 = vadd.f32 1.0, %v1698_v30 }
 0x39e   :  { %1409 = vst [vmem:[#allocation5 + $0x90] sm:$0xff] %v1194_v32  ;;  %1705 = vpow2.f32 %v1570_v43  ;;  %v1220_v34 = vand.u32 2147483647, %v2554_v26  ;;  %v1222_v31 = vand.u32 2147483648, %v2554_v26  ;;  %v1235_v40 = vand.u32 2147483647, %v2557_v42  ;;  %vm1203_vm7 = vmor %vm1201_vm5, %vm1202_vm6 }
 0x39f   :  { %v726_v61 = vpop.f32.mrf.mxu2  ;;  %v775_v4 = vpop.f32.mrf.mxu3  ;;  %v1199_v19 = vmul.f32 %v1696_v28, %v1198_v21  ;;  %1707 = vpow2.f32 %v1571_v48  ;;  %v1237_v62 = vand.u32 2147483648, %v2557_v42  ;;  %vm1206_vm8 = vcmp.eq.f32.partialorder %v1205_v52, 8.507059e+37 }
 0x3a0   :  { %v1700_v22 = vpop.eup %1699  ;;  %1709 = vrcp.f32 %v2565_v33  ;;  %v1208_v0 = vor.u32 1.1754944e-38, %v1207_v1  ;;  %vm1216_vm9 = vweird.f32 %v2554_v26  ;;  %vm1231_vm10 = vweird.f32 %v2557_v42 }
 0x3a1   :  { %v2569_v59 = vadd.f32 1.0, %v1700_v22  ;;  %v1702_v60 = vpop.eup %1701  ;;  %v1200_v56 = vadd.f32 %v1696_v28, %v1199_v19  ;;  %vm2581_vm11 = vcmp.eq.f32.partialorder %v1220_v34, 8.507059e+37  ;;  %v1223_v5 = vor.u32 1.1754944e-38, %v1222_v31 }
 0x3a2   :  { %v1704_v29 = vpop.eup %1703  ;;  %v1212_v11 = vmul.f32 %v1702_v60, %v2554_v26  ;;  %vm2585_vm12 = vcmp.eq.f32.partialorder %v1235_v40, 8.507059e+37  ;;  %v1238_v23 = vor.u32 1.1754944e-38, %v1237_v62  ;;  %v727_v50 = vadd.f32 %v726_v61, %v2300_v18 }
 0x3a3   :  { %1711 = vrcp.f32 %v2569_v59  ;;  %v1204_v57 = vsel %vm1203_vm7, %v1696_v28, %v1200_v56  ;;  %v1227_v3 = vmul.f32 %v1704_v29, %v2557_v42  ;;  %vm1217_vm13 = vweird.f32 %v1702_v60 }
 0x3a4   :  { %v1209_v55 = vsel %vm1206_vm8, %v1208_v0, %v1204_v57  ;;  %v1213_v36 = vsub.f32 1.0, %v1212_v11  ;;  %v1706_v6 = vpop.eup %1705  ;;  %vm1246_vm14 = vweird.f32 %v2565_v33  ;;  %vm1232_vm15 = vweird.f32 %v1704_v29  ;;  %vm1218_vm0 = vmor %vm1216_vm9, %vm1217_vm13 }
 0x3a5   :  { %1410 = vst [vmem:[#allocation5 + $0x98] sm:$0xff] %v1209_v55  ;;  %v1228_v2 = vsub.f32 1.0, %v1227_v3  ;;  %v1708_v37 = vpop.eup %1707  ;;  %v2591_v10 = vadd.f32 1.0, %v1706_v6  ;;  %v1250_v44 = vand.u32 2147483647, %v2565_v33  ;;  %v1252_v54 = vand.u32 2147483648, %v2565_v33  ;;  %vm1233_vm1 = vmor %vm1231_vm10, %vm1232_vm15 }
 0x3a6   :  { %v1214_v24 = vmul.f32 %v1702_v60, %v1213_v36  ;;  %v1710_v25 = vpop.eup %1709  ;;  %v2594_v63 = vadd.f32 1.0, %v1708_v37  ;;  %v1265_v39 = vand.u32 2147483647, %v2569_v59  ;;  %v776_v12 = vadd.f32 %v775_v4, %v2302_v41 }
 0x3a7   :  { %v729_v13 = vpop.f32.mrf.mxu2  ;;  %v1229_v35 = vmul.f32 %v1704_v29, %v1228_v2  ;;  %v1242_v7 = vmul.f32 %v1710_v25, %v2565_v33  ;;  %1713 = vrcp.f32 %v2591_v10  ;;  %v778_v17 = vpop.f32.mrf.mxu3  ;;  %v1572_v20 = vmul.f32 -1.442695, %v727_v50 }
 0x3a8   :  { %v1215_v53 = vadd.f32 %v1702_v60, %v1214_v24  ;;  %v730_v9 = vadd.f32 %v729_v13, %v2300_v18  ;;  %1715 = vrcp.f32 %v2594_v63  ;;  %vm1247_vm2 = vweird.f32 %v1710_v25 }
 0x3a9   :  { %v1712_v14 = vpop.eup %1711  ;;  %v1230_v27 = vadd.f32 %v1704_v29, %v1229_v35  ;;  %v1243_v15 = vsub.f32 1.0, %v1242_v7  ;;  %v1267_v42 = vand.u32 2147483648, %v2569_v59  ;;  %vm2615_vm3 = vcmp.eq.f32.partialorder %v1250_v44, 8.507059e+37  ;;  %vm1248_vm5 = vmor %vm1246_vm14, %vm1247_vm2 }
 0x3aa   :  { %v1257_v16 = vmul.f32 %v1712_v14, %v2569_v59  ;;  %v1219_v45 = vsel %vm1218_vm0, %v1702_v60, %v1215_v53  ;;  %v1253_v30 = vor.u32 1.1754944e-38, %v1252_v54  ;;  %vm1262_vm4 = vweird.f32 %v1712_v14 }
 0x3ab   :  { %v1224_v8 = vsel %vm2581_vm11, %v1223_v5, %v1219_v45  ;;  %v1234_v26 = vsel %vm1233_vm1, %v1704_v29, %v1230_v27  ;;  %v1244_v51 = vmul.f32 %v1710_v25, %v1243_v15  ;;  %1717 = vpow2.f32 %v1572_v20 }
 0x3ac   :  { %v1258_v28 = vsub.f32 1.0, %v1257_v16  ;;  %1411 = vst [vmem:[#allocation5 + $0xa0] sm:$0xff] %v1224_v8  ;;  %v1239_v38 = vsel %vm2585_vm12, %v1238_v23, %v1234_v26  ;;  %v1573_v49 = vmul.f32 -1.442695, %v776_v12  ;;  %v1574_v21 = vmul.f32 -1.442695, %v730_v9 }
 0x3ad   :  { %1412 = vst [vmem:[#allocation5 + $0xa8] sm:$0xff] %v1239_v38  ;;  %v1714_v48 = vpop.eup %1713  ;;  %v1245_v61 = vadd.f32 %v1710_v25, %v1244_v51  ;;  %vm1261_vm6 = vweird.f32 %v2569_v59  ;;  %vm1266_vm7 = vcmp.eq.f32.partialorder %v1265_v39, 8.507059e+37  ;;  %v1268_v4 = vor.u32 1.1754944e-38, %v1267_v42 }
 0x3ae   :  { %v1259_v47 = vmul.f32 %v1712_v14, %v1258_v28  ;;  %v1272_v52 = vmul.f32 %v1714_v48, %v2591_v10  ;;  %vm1263_vm8 = vmor %vm1261_vm6, %vm1262_vm4  ;;  %1719 = vpow2.f32 %v1573_v49  ;;  %v779_v22 = vadd.f32 %v778_v17, %v2302_v41  ;;  %v1716_v34 = vpop.eup %1715 }
 0x3af   :  { %v1249_v1 = vsel %vm1248_vm5, %v1710_v25, %v1245_v61  ;;  %v731_v19 = vpop.f32.mrf.mxu2  ;;  %1721 = vpow2.f32 %v1574_v21  ;;  %v1282_v59 = vand.u32 2147483648, %v2591_v10  ;;  %v1287_v40 = vmul.f32 %v1716_v34, %v2594_v63  ;;  %v780_v29 = vpop.f32.mrf.mxu3 }
 0x3b0   :  { %v1260_v32 = vadd.f32 %v1712_v14, %v1259_v47  ;;  %v1254_v31 = vsel %vm2615_vm3, %v1253_v30, %v1249_v1  ;;  %v1273_v33 = vsub.f32 1.0, %v1272_v52  ;;  %v1575_v62 = vmul.f32 -1.442695, %v779_v22 }
 0x3b1   :  { %1413 = vst [vmem:[#allocation5 + $0xb0] sm:$0xff] %v1254_v31  ;;  %vm1277_vm9 = vweird.f32 %v1714_v48  ;;  %v1280_v11 = vand.u32 2147483647, %v2591_v10  ;;  %v732_v57 = vadd.f32 %v731_v19, %v2300_v18  ;;  %v1718_v3 = vpop.eup %1717  ;;  %vm1276_vm10 = vweird.f32 %v2591_v10 }
 0x3b2   :  { %v1264_v60 = vsel %vm1263_vm8, %v1712_v14, %v1260_v32  ;;  %v1274_v0 = vmul.f32 %v1714_v48, %v1273_v33  ;;  %v1288_v55 = vsub.f32 1.0, %v1287_v40  ;;  %v1297_v36 = vand.u32 2147483648, %v2594_v63  ;;  %vm1278_vm11 = vmor %vm1276_vm10, %vm1277_vm9 }
 0x3b3   :  { %v1269_v56 = vsel %vm1266_vm7, %v1268_v4, %v1264_v60  ;;  %1723 = vpow2.f32 %v1575_v62  ;;  %v905_v5 = vadd.f32 1.0, %v1718_v3  ;;  %v1576_v6 = vmul.f32 -1.442695, %v732_v57 }
 0x3b4   :  { %1414 = vst [vmem:[#allocation5 + $0xb8] sm:$0xff] %v1269_v56  ;;  %v1275_v46 = vadd.f32 %v1714_v48, %v1274_v0  ;;  %v781_v2 = vadd.f32 %v780_v29, %v2302_v41  ;;  %v1720_v58 = vpop.eup %1719  ;;  %v1283_v23 = vor.u32 1.1754944e-38, %v1282_v59  ;;  %v1289_v50 = vmul.f32 %v1716_v34, %v1288_v55 }
 0x3b5   :  { %vm1292_vm12 = vweird.f32 %v1716_v34  ;;  %v1295_v37 = vand.u32 2147483647, %v2594_v63  ;;  %v1722_v18 = vpop.eup %1721  ;;  %vm1281_vm13 = vcmp.eq.f32.partialorder %v1280_v11, 8.507059e+37  ;;  %1725 = vrcp.f32 %v905_v5 }
 0x3b6   :  { %v1279_v24 = vsel %vm1278_vm11, %v1714_v48, %v1275_v46  ;;  %v1290_v13 = vadd.f32 %v1716_v34, %v1289_v50  ;;  %vm1291_vm14 = vweird.f32 %v2594_v63  ;;  %v906_v25 = vadd.f32 1.0, %v1720_v58 }
 0x3b7   :  { %v1284_v10 = vsel %vm1281_vm13, %v1283_v23, %v1279_v24  ;;  %vm1293_vm15 = vmor %vm1291_vm14, %vm1292_vm12  ;;  %v1298_v35 = vor.u32 1.1754944e-38, %v1297_v36  ;;  %v2635_v41 = vadd.f32 1.0, %v1722_v18  ;;  %1727 = vpow2.f32 %v1576_v6 }
 0x3b8   :  { %1415 = vst [vmem:[#allocation5 + $0xc0] sm:$0xff] %v1284_v10  ;;  %v1577_v44 = vmul.f32 -1.442695, %v781_v2  ;;  %v1294_v53 = vsel %vm1293_vm15, %v1716_v34, %v1290_v13  ;;  %vm1296_vm0 = vcmp.eq.f32.partialorder %v1295_v37, 8.507059e+37  ;;  %1729 = vrcp.f32 %v906_v25 }
 0x3b9   :  { %v1724_v14 = vpop.eup %1723  ;;  %v1299_v7 = vsel %vm1296_vm0, %v1298_v35, %v1294_v53  ;;  %1731 = vrcp.f32 %v2635_v41  ;;  %v1310_v63 = vand.u32 2147483647, %v905_v5  ;;  %v1312_v27 = vand.u32 2147483648, %v905_v5 }
 0x3ba   :  { %1416 = vst [vmem:[#allocation5 + $0xc8] sm:$0xff] %v1299_v7  ;;  %v2638_v54 = vadd.f32 1.0, %v1724_v14  ;;  %1733 = vpow2.f32 %v1577_v44  ;;  %vm1306_vm1 = vweird.f32 %v905_v5  ;;  %v1325_v28 = vand.u32 2147483647, %v906_v25 }
 0x3bb   :  { %v1726_v17 = vpop.eup %1725  ;;  %vm2643_vm2 = vcmp.eq.f32.partialorder %v1310_v63, 8.507059e+37  ;;  %v1313_v8 = vor.u32 1.1754944e-38, %v1312_v27  ;;  %vm1321_vm4 = vweird.f32 %v906_v25  ;;  %v1327_v30 = vand.u32 2147483648, %v906_v25 }
 0x3bc   :  { %v1302_v16 = vmul.f32 %v1726_v17, %v905_v5  ;;  %1735 = vrcp.f32 %v2638_v54  ;;  %vm1307_vm3 = vweird.f32 %v1726_v17  ;;  %v1340_v47 = vand.u32 2147483647, %v2635_v41 }
 0x3bd   :  { %v1728_v39 = vpop.eup %1727  ;;  %v1342_v49 = vand.u32 2147483648, %v2635_v41  ;;  %vm1308_vm5 = vmor %vm1306_vm1, %vm1307_vm3  ;;  %vm2654_vm7 = vcmp.eq.f32.partialorder %v1325_v28, 8.507059e+37  ;;  %vm1336_vm8 = vweird.f32 %v2635_v41  ;;  %v1328_v60 = vor.u32 1.1754944e-38, %v1327_v30 }
 0x3be   :  { %v1730_v12 = vpop.eup %1729  ;;  %v1303_v45 = vsub.f32 1.0, %v1302_v16  ;;  %v2641_v15 = vadd.f32 1.0, %v1728_v39  ;;  %vm1341_vm11 = vcmp.eq.f32.partialorder %v1340_v47, 8.507059e+37  ;;  %v1355_v29 = vand.u32 2147483647, %v2638_v54 }
 0x3bf   :  { %v1732_v20 = vpop.eup %1731  ;;  %v1317_v26 = vmul.f32 %v1730_v12, %v906_v25  ;;  %vm1322_vm6 = vweird.f32 %v1730_v12  ;;  %v1343_v59 = vor.u32 1.1754944e-38, %v1342_v49  ;;  %v1357_v0 = vand.u32 2147483648, %v2638_v54 }
 0x3c0   :  { %v1304_v38 = vmul.f32 %v1726_v17, %v1303_v45  ;;  %v1332_v51 = vmul.f32 %v1732_v20, %v2635_v41  ;;  %1737 = vrcp.f32 %v2641_v15  ;;  %v1734_v42 = vpop.eup %1733  ;;  %vm1337_vm9 = vweird.f32 %v1732_v20  ;;  %vm1323_vm10 = vmor %vm1321_vm4, %vm1322_vm6 }
 0x3c1   :  { %v1318_v43 = vsub.f32 1.0, %v1317_v26  ;;  %v2651_v21 = vadd.f32 1.0, %v1734_v42  ;;  %vm1338_vm12 = vmor %vm1336_vm8, %vm1337_vm9  ;;  %vm1351_vm14 = vweird.f32 %v2638_v54  ;;  %v1372_v6 = vand.u32 2147483648, %v2641_v15 }
 0x3c2   :  { %v1305_v48 = vadd.f32 %v1726_v17, %v1304_v38  ;;  %v1333_v61 = vsub.f32 1.0, %v1332_v51  ;;  %v1736_v32 = vpop.eup %1735  ;;  %v1358_v58 = vor.u32 1.1754944e-38, %v1357_v0  ;;  %v1370_v50 = vand.u32 2147483647, %v2641_v15 }
 0x3c3   :  { %v1319_v52 = vmul.f32 %v1730_v12, %v1318_v43  ;;  %v1347_v19 = vmul.f32 %v1736_v32, %v2638_v54  ;;  %1739 = vrcp.f32 %v2651_v21  ;;  %vm1352_vm13 = vweird.f32 %v1736_v32 }
 0x3c4   :  { %v1309_v4 = vsel %vm1308_vm5, %v1726_v17, %v1305_v48  ;;  %v1334_v22 = vmul.f32 %v1732_v20, %v1333_v61  ;;  %vm1353_vm15 = vmor %vm1351_vm14, %vm1352_vm13  ;;  %vm1356_vm1 = vcmp.eq.f32.partialorder %v1355_v29, 8.507059e+37  ;;  %v1373_v13 = vor.u32 1.1754944e-38, %v1372_v6 }
 0x3c5   :  { %v1314_v34 = vsel %vm2643_vm2, %v1313_v8, %v1309_v4  ;;  %v1320_v31 = vadd.f32 %v1730_v12, %v1319_v52  ;;  %v1348_v40 = vsub.f32 1.0, %v1347_v19  ;;  %vm1366_vm2 = vweird.f32 %v2641_v15 }
 0x3c6   :  { %v1738_v33 = vpop.eup %1737  ;;  %1417 = vst [vmem:[#allocation5 + $0xd0] sm:$0xff] %v1314_v34  ;;  %v1335_v56 = vadd.f32 %v1732_v20, %v1334_v22  ;;  %vm1371_vm4 = vcmp.eq.f32.partialorder %v1370_v50, 8.507059e+37  ;;  %v1387_v41 = vand.u32 2147483648, %v2651_v21  ;;  %v1385_v53 = vand.u32 2147483647, %v2651_v21 }
 0x3c7   :  { %v1324_v62 = vsel %vm1323_vm10, %v1730_v12, %v1320_v31  ;;  %v1362_v11 = vmul.f32 %v1738_v33, %v2641_v15  ;;  %v1349_v55 = vmul.f32 %v1736_v32, %v1348_v40  ;;  %vm1367_vm0 = vweird.f32 %v1738_v33 }
 0x3c8   :  { %v1329_v57 = vsel %vm2654_vm7, %v1328_v60, %v1324_v62  ;;  %v1339_v3 = vsel %vm1338_vm12, %v1732_v20, %v1335_v56  ;;  %vm1368_vm3 = vmor %vm1366_vm2, %vm1367_vm0  ;;  %vm1381_vm6 = vweird.f32 %v2651_v21  ;;  %v1388_v54 = vor.u32 1.1754944e-38, %v1387_v41 }
 0x3c9   :  { %1418 = vst [vmem:[#allocation5 + $0xd8] sm:$0xff] %v1329_v57  ;;  %v1344_v36 = vsel %vm1341_vm11, %v1343_v59, %v1339_v3  ;;  %v1363_v46 = vsub.f32 1.0, %v1362_v11  ;;  %v1350_v5 = vadd.f32 %v1736_v32, %v1349_v55  ;;  %v1740_v2 = vpop.eup %1739  ;;  %vm1386_vm8 = vcmp.eq.f32.partialorder %v1385_v53, 8.507059e+37 }
 0x3ca   :  { %1419 = vst [vmem:[#allocation5 + $0xe0] sm:$0xff] %v1344_v36  ;;  %v1377_v18 = vmul.f32 %v1740_v2, %v2651_v21  ;;  %vm1382_vm5 = vweird.f32 %v1740_v2 }
 0x3cb   :  { %v1364_v23 = vmul.f32 %v1738_v33, %v1363_v46  ;;  %v1354_v37 = vsel %vm1353_vm15, %v1736_v32, %v1350_v5  ;;  %vm1383_vm7 = vmor %vm1381_vm6, %vm1382_vm5 }
 0x3cc   :  { %v1359_v24 = vsel %vm1356_vm1, %v1358_v58, %v1354_v37  ;;  %v1378_v25 = vsub.f32 1.0, %v1377_v18 }
 0x3cd   :  { %v1365_v10 = vadd.f32 %v1738_v33, %v1364_v23  ;;  %1420 = vst [vmem:[#allocation5 + $0xe8] sm:$0xff] %v1359_v24 }
 0x3ce   :  { %v1379_v14 = vmul.f32 %v1740_v2, %v1378_v25 }
 0x3cf   :  { %v1369_v35 = vsel %vm1368_vm3, %v1738_v33, %v1365_v10 }
 0x3d0   :  { %v1374_v44 = vsel %vm1371_vm4, %v1373_v13, %v1369_v35  ;;  %v1380_v7 = vadd.f32 %v1740_v2, %v1379_v14 }
 0x3d1   :  { %1421 = vst [vmem:[#allocation5 + $0xf0] sm:$0xff] %v1374_v44 }
 0x3d2   :  { %v1384_v17 = vsel %vm1383_vm7, %v1740_v2, %v1380_v7 }
 0x3d3   :  { %v1389_v63 = vsel %vm1386_vm8, %v1388_v54, %v1384_v17 }
 0x3d4   :  { %1422 = vst [vmem:[#allocation5 + $0xf8] sm:$0xff] %v1389_v63 }
 0x3d5   :  { %1435 = dma.vmem_to_hbm [thread:$0]  %s1428_s20, 4096, %s1430_s23, [#allocation4], %s1798_s24, %s1798_s24, %s1799_s25  }
 0x3d6   :  { %1791 = dma.done.wait [#allocation4], 4096  }
 0x3d7   :  { %1792 = vsyncadd [#allocation4], 4294963200 }
 0x3d8   :  { %1440 = vsyncpa [#allocation3], 1 }
 0x3d9   :  { %1441 = vsyncpa [#allocation4], 1 }

</bundles_post_ra>
